<compile_context>
chip_gen: v5e
topology: v5e:2x2
jax: 0.10.0
libtpu: 0.0.40
codegen_flags: <defaults>
</compile_context>

<pallas_src>
import functools

import jax
import jax.numpy as jnp
import numpy as np
from jax.experimental import pallas as pl
from jax.experimental.pallas import tpu as pltpu

LANE = 128          # lane width: the fc2 (Q-value) output is padded to this
ROW_ALIGN = 16      # M-tile alignment (bf16 sublane-packing friendly)
MIN_SPLIT_M = 256   # below this, use one full-extent block (no boundary block)

_CONV_GEOM = ((8, 8, 4), (4, 4, 2), (3, 3, 1))   # (kh, kw, stride) per conv


def _round_up(x, m):
    return (x + m - 1) // m * m


def _detect_chip_config():
    """(MAX_TILE_M, vmem_limit_bytes) per chip generation.

    v5e/v6e have 128 MiB physical VMEM -> big tiles amortize per-step
    overhead; v7x has only 64 MiB per TensorCore -> keep 512-row / 32 MiB."""
    try:
        vmem = pltpu.get_tpu_info().vmem_capacity_bytes
        if vmem >= 100 * 1024 * 1024:            # v5e / v6e (128 MiB)
            return 1024, 64 * 1024 * 1024
    except Exception:                            # conservative fallback
        pass
    return 512, 32 * 1024 * 1024                 # v7x and unknown chips


MAX_TILE_M, VMEM_LIMIT = _detect_chip_config()


def _tiles(M):
    """Balanced M tiling.  Small M: one full-extent block (no padding, no
    boundary block).  Large M: >=2 tiles so both v7x TCs are fed and the
    pipeline overlaps; tiles are balanced to avoid a pathological last tile."""
    if M <= MIN_SPLIT_M:
        return M, 1
    n = max(pl.cdiv(M, MAX_TILE_M), 2)
    tm = _round_up(pl.cdiv(M, n), ROW_ALIGN)
    return tm, pl.cdiv(M, tm)


# ---------------------------------------------------------------------------
# Pallas kernel 1: fused  y = [relu]( x @ W + b ), M-tiled, bf16 MXU matmul
# ---------------------------------------------------------------------------
def _matmul_bias_act_kernel(apply_relu, x_ref, w_ref, b_ref, o_ref):
    acc = jnp.dot(x_ref[...], w_ref[...], preferred_element_type=jnp.float32)
    acc = acc + b_ref[...]                      # (tm, N) + (1, N), f32
    if apply_relu:
        acc = jnp.maximum(acc, 0.0)
    o_ref[...] = acc.astype(o_ref.dtype)


def pallas_matmul_bias(x, w, b2d, *, relu, out_dtype):
    """y = [relu](x @ w + b).  x:(M,K) bf16, w:(K,N) bf16, b2d:(1,N) f32.
    The M axis is tiled on a 'parallel' grid axis; W and b stay resident."""
    M, K = x.shape
    K2, N = w.shape
    assert K == K2
    tm, n = _tiles(M)
    return pl.pallas_call(
        functools.partial(_matmul_bias_act_kernel, relu),
        out_shape=jax.ShapeDtypeStruct((M, N), out_dtype),
        grid=(n,),
        in_specs=[
            pl.BlockSpec((tm, K), lambda i: (i, 0)),
            pl.BlockSpec((K, N), lambda i: (0, 0)),
            pl.BlockSpec((1, N), lambda i: (0, 0)),
        ],
        out_specs=pl.BlockSpec((tm, N), lambda i: (i, 0)),
        compiler_params=pltpu.CompilerParams(
            dimension_semantics=("parallel",),
            vmem_limit_bytes=VMEM_LIMIT),
    )(x, w, b2d)


# ---------------------------------------------------------------------------
# Pallas kernel 2: fused FC head  out = relu(x @ W1 + b1) @ W2 + b2
# (hidden activation stays in VMEM/vregs; no HBM round-trip between FC1/FC2)
# ---------------------------------------------------------------------------
def _mlp_head_kernel(x_ref, w1_ref, b1_ref, w2_ref, b2_ref, o_ref):
    h = jnp.dot(x_ref[...], w1_ref[...], preferred_element_type=jnp.float32)
    h = jnp.maximum(h + b1_ref[...], 0.0)
    y = jnp.dot(h.astype(jnp.bfloat16), w2_ref[...],
                preferred_element_type=jnp.float32)
    o_ref[...] = (y + b2_ref[...]).astype(o_ref.dtype)


def pallas_mlp_head(x, w1, b1, w2, b2):
    M, K = x.shape
    K1, H = w1.shape
    H2, N = w2.shape
    assert K == K1 and H == H2 and N % LANE == 0
    tm, n = _tiles(M)
    return pl.pallas_call(
        _mlp_head_kernel,
        out_shape=jax.ShapeDtypeStruct((M, N), jnp.float32),
        grid=(n,),
        in_specs=[
            pl.BlockSpec((tm, K), lambda i: (i, 0)),
            pl.BlockSpec((K, H), lambda i: (0, 0)),
            pl.BlockSpec((1, H), lambda i: (0, 0)),
            pl.BlockSpec((H, N), lambda i: (0, 0)),
            pl.BlockSpec((1, N), lambda i: (0, 0)),
        ],
        out_specs=pl.BlockSpec((tm, N), lambda i: (i, 0)),
        compiler_params=pltpu.CompilerParams(
            dimension_semantics=("parallel",),
            vmem_limit_bytes=VMEM_LIMIT),
    )(x, w1, b1, w2, b2)


# ---------------------------------------------------------------------------
# im2col glue (plain JAX slicing; no FLOPs) and conv layer
# ---------------------------------------------------------------------------
def _im2col(x_nhwc, kh, kw, stride):
    # TODO(synk): move im2col into the conv Pallas kernel (strided VMEM reads
    # of an NHWC row band) so the patch matrix is never materialized in HBM
    # for large training batches.
    n, h, w, c = x_nhwc.shape
    oh = (h - kh) // stride + 1
    ow = (w - kw) // stride + 1
    patches = []
    for i in range(kh):
        for j in range(kw):
            patches.append(
                x_nhwc[:, i:i + stride * oh:stride, j:j + stride * ow:stride, :])
    p = jnp.stack(patches, axis=3)                 # (N, oh, ow, kh*kw, C)
    return p.reshape(n * oh * ow, kh * kw * c), oh, ow


def _conv_layer(x_nhwc, w_packed, b_packed, kh, kw, stride):
    cols, oh, ow = _im2col(x_nhwc, kh, kw, stride)
    y = pallas_matmul_bias(cols, w_packed, b_packed, relu=True,
                           out_dtype=jnp.bfloat16)
    n = x_nhwc.shape[0]
    return y.reshape(n, oh, ow, w_packed.shape[1])   # NHWC, real channel count


# ---------------------------------------------------------------------------
# One-time weight packing (done outside the forward pass)
# ---------------------------------------------------------------------------
def _conv_out_hw(hw, layers):
    h, w = hw
    for kh, kw, s in layers:
        h = (h - kh) // s + 1
        w = (w - kw) // s + 1
    return h, w


def pack_dqn_params(params, input_hw):
    """Repack PyTorch-layout DQN params into bf16, matmul-ready layouts.

    Conv weights go to im2col order (kh*kw*ic, oc) with REAL channel counts;
    fc1's input-feature axis is permuted from PyTorch's (c, h, w) flatten to
    the kernel's NHWC (h, w, c) flatten; fc2's output is zero-padded to 128
    lanes (zero weights + zero bias, sliced off after the kernel)."""
    (w1, b1), (w2, b2), (w3, b3), (fw1, fb1), (fw2, fb2) = params

    def pack_conv(w_oihw, b):
        oc, ic, kh, kw = w_oihw.shape
        wm = jnp.transpose(w_oihw, (2, 3, 1, 0)).reshape(kh * kw * ic, oc)
        return wm.astype(jnp.bfloat16), b.reshape(1, oc).astype(jnp.float32)

    conv_packed = (pack_conv(w1, b1), pack_conv(w2, b2), pack_conv(w3, b3))

    oh3, ow3 = _conv_out_hw(input_hw, _CONV_GEOM)
    c3 = w3.shape[0]
    hidden = fw1.shape[0]
    n_actions = fw2.shape[0]
    n_act_pad = _round_up(n_actions, LANE)

    # fc1: permute input features from NCHW-flatten to NHWC-flatten order and
    # pre-transpose so the forward pass is a plain x @ W.
    f = fw1.reshape(hidden, c3, oh3, ow3)
    f = jnp.transpose(f, (2, 3, 1, 0)).reshape(oh3 * ow3 * c3, hidden)
    fw1p = f.astype(jnp.bfloat16)
    fb1p = fb1.reshape(1, hidden).astype(jnp.float32)

    fw2p = jnp.pad(fw2.T, ((0, 0), (0, n_act_pad - n_actions))).astype(jnp.bfloat16)
    fb2p = jnp.pad(fb2, (0, n_act_pad - n_actions)).reshape(1, n_act_pad)
    fb2p = fb2p.astype(jnp.float32)

    return dict(
        conv=conv_packed,
        conv_geom=_CONV_GEOM,
        fc=(fw1p, fb1p, fw2p, fb2p),
        n_actions=n_actions,
    )


# ---------------------------------------------------------------------------
# Full DQN forward (Pallas) and pure-JAX reference
# ---------------------------------------------------------------------------
def dqn_forward_pallas(x_nchw, packed):
    # TODO(synk): for batch<=32 inference, fuse the whole conv+FC stack into a
    # single pallas_call with VMEM-resident bf16 weights (~1.2 MB total) to
    # remove the remaining HBM activation round-trips and XLA glue.
    x = jnp.transpose(x_nchw, (0, 2, 3, 1)).astype(jnp.bfloat16)  # NCHW->NHWC
    for (wp, bp), (kh, kw, s) in zip(packed["conv"], packed["conv_geom"]):
        x = _conv_layer(x, wp, bp, kh, kw, s)
    n = x.shape[0]
    x = x.reshape(n, -1)          # NHWC flatten; fw1p is permuted to match
    fw1p, fb1p, fw2p, fb2p = packed["fc"]
    out = pallas_mlp_head(x, fw1p, fb1p, fw2p, fb2p)
    return out[:, :packed["n_actions"]]


def dqn_forward_reference(x_nchw, params):
    (w1, b1), (w2, b2), (w3, b3), (fw1, fb1), (fw2, fb2) = params

    def conv(x, w, b, s):
        y = jax.lax.conv_general_dilated(
            x, w, (s, s), "VALID",
            dimension_numbers=("NCHW", "OIHW", "NCHW"))
        return jax.nn.relu(y + b[None, :, None, None])

    y = conv(x_nchw, w1, b1, 4)
    y = conv(y, w2, b2, 2)
    y = conv(y, w3, b3, 1)
    y = y.reshape(y.shape[0], -1)
    y = jax.nn.relu(y @ fw1.T + fb1)
    return y @ fw2.T + fb2


# ---------------------------------------------------------------------------
# Deterministic parameter init (PyTorch-style uniform(-1/sqrt(fan_in), ...))
# ---------------------------------------------------------------------------
def _init_conv(key, oc, ic, kh, kw):
    k1, k2 = jax.random.split(key)
    bound = 1.0 / np.sqrt(ic * kh * kw)
    w = jax.random.uniform(k1, (oc, ic, kh, kw), jnp.float32, -bound, bound)
    b = jax.random.uniform(k2, (oc,), jnp.float32, -bound, bound)
    return w, b


def _init_linear(key, out_f, in_f):
    k1, k2 = jax.random.split(key)
    bound = 1.0 / np.sqrt(in_f)
    w = jax.random.uniform(k1, (out_f, in_f), jnp.float32, -bound, bound)
    b = jax.random.uniform(k2, (out_f,), jnp.float32, -bound, bound)
    return w, b


if __name__ == "__main__":
    # Small-but-valid shapes: the conv stack (k8s4, k4s2, k3s1) needs H,W >= 36.
    batch, in_c, hw, n_actions = 2, 4, 52, 6

    # conv output spatial: 52 -> 12 -> 5 -> 3  => conv_out_size = 64*3*3 = 576
    oh3, ow3 = _conv_out_hw((hw, hw), _CONV_GEOM)
    conv_out_size = 64 * oh3 * ow3

    root = jax.random.PRNGKey(0)
    keys = jax.random.split(root, 6)
    params = (
        _init_conv(keys[0], 32, in_c, 8, 8),
        _init_conv(keys[1], 64, 32, 4, 4),
        _init_conv(keys[2], 64, 64, 3, 3),
        _init_linear(keys[3], 512, conv_out_size),
        _init_linear(keys[4], n_actions, 512),
    )

    x = jax.random.normal(keys[5], (batch, in_c, hw, hw), jnp.float32)

    # One-time weight packing (outside the forward / jit boundary).
    packed = pack_dqn_params(params, (hw, hw))

    fwd = jax.jit(lambda inp: dqn_forward_pallas(inp, packed))
    out = jax.block_until_ready(fwd(x))

    ref = jax.block_until_ready(dqn_forward_reference(x, params))

    assert out.shape == (batch, n_actions), out.shape
    assert np.allclose(np.asarray(out), np.asarray(ref), rtol=1e-2, atol=1e-2), (
        "Pallas output diverges from JAX reference")

    print("KERNEL_OK")
</pallas_src>

<mosaic_0001>
module attributes {stable_mosaic.version = 11 : i64} {
  func.func @_matmul_bias_act_kernel(%arg0: i32, %arg1: memref<144x256xbf16, #tpu.memory_space<vmem>>, %arg2: memref<256x32xbf16, #tpu.memory_space<vmem>>, %arg3: memref<1x32xf32, #tpu.memory_space<vmem>>, %arg4: memref<144x32xbf16, #tpu.memory_space<vmem>>) attributes {dimension_semantics = [#tpu.dimension_semantics<parallel>], iteration_bounds = array<i64: 2>, scalar_prefetch = 0 : i64, scratch_operands = 0 : i64, tpu.core_type = #tpu.core_type<tc>, window_params = [{transform_indices = @transform_0, window_bounds = array<i64: 144, 256>}, {pipeline_mode = #tpu.pipeline_mode<synchronous>, transform_indices = @transform_1, window_bounds = array<i64: 256, 32>}, {pipeline_mode = #tpu.pipeline_mode<synchronous>, transform_indices = @transform_2, window_bounds = array<i64: 1, 32>}, {transform_indices = @transform_3, window_bounds = array<i64: 144, 32>}]} {
    %c0 = arith.constant 0 : index
    %c0_0 = arith.constant 0 : index
    %0 = vector.load %arg1[%c0, %c0_0] : memref<144x256xbf16, #tpu.memory_space<vmem>>, vector<144x256xbf16>
    %c0_1 = arith.constant 0 : index
    %c0_2 = arith.constant 0 : index
    %1 = vector.load %arg2[%c0_1, %c0_2] : memref<256x32xbf16, #tpu.memory_space<vmem>>, vector<256x32xbf16>
    %cst = arith.constant dense<0.000000e+00> : vector<144x32xf32>
    %2 = tpu.matmul %0, %1, %cst {dimension_numbers = #tpu.dot_dimension_numbers<[1], [0], [0], [1], [0, 0, 1, 1], [], []>} : vector<144x256xbf16>, vector<256x32xbf16>, vector<144x32xf32> -> vector<144x32xf32>
    %c0_3 = arith.constant 0 : index
    %c0_4 = arith.constant 0 : index
    %3 = vector.load %arg3[%c0_3, %c0_4] : memref<1x32xf32, #tpu.memory_space<vmem>>, vector<1x32xf32>
    %4 = vector.broadcast %3 : vector<1x32xf32> to vector<144x32xf32>
    %5 = arith.addf %2, %4 : vector<144x32xf32>
    %cst_5 = arith.constant 0.000000e+00 : f32
    %6 = vector.broadcast %cst_5 : f32 to vector<144x32xf32>
    %7 = arith.maximumf %5, %6 : vector<144x32xf32>
    %8 = arith.truncf %7 : vector<144x32xf32> to vector<144x32xbf16>
    %c0_6 = arith.constant 0 : index
    %c0_7 = arith.constant 0 : index
    %9 = vector.load %arg4[%c0_6, %c0_7] : memref<144x32xbf16, #tpu.memory_space<vmem>>, vector<144x32xbf16>
    tpu.vector_store %arg4[%c0_6, %c0_7], %8 {strides = array<i32>} : memref<144x32xbf16, #tpu.memory_space<vmem>>, vector<144x32xbf16>,
    return
  }
  func.func @transform_0(%arg0: i32) -> (i32, i32) {
    %c0_i32 = arith.constant 0 : i32
    %c0_i32_0 = arith.constant 0 : i32
    return %arg0, %c0_i32 : i32, i32
  }
  func.func @transform_1(%arg0: i32) -> (i32, i32) {
    %c0_i32 = arith.constant 0 : i32
    %c0_i32_0 = arith.constant 0 : i32
    %c0_i32_1 = arith.constant 0 : i32
    return %c0_i32, %c0_i32_0 : i32, i32
  }
  func.func @transform_2(%arg0: i32) -> (i32, i32) {
    %c0_i32 = arith.constant 0 : i32
    %c0_i32_0 = arith.constant 0 : i32
    %c0_i32_1 = arith.constant 0 : i32
    return %c0_i32, %c0_i32_0 : i32, i32
  }
  func.func @transform_3(%arg0: i32) -> (i32, i32) {
    %c0_i32 = arith.constant 0 : i32
    %c0_i32_0 = arith.constant 0 : i32
    return %arg0, %c0_i32 : i32, i32
  }
}

module attributes {stable_mosaic.version = 11 : i64} {
  func.func @_matmul_bias_act_kernel(%arg0: i32, %arg1: memref<50x512xbf16, #tpu.memory_space<vmem>>, %arg2: memref<512x64xbf16, #tpu.memory_space<vmem>>, %arg3: memref<1x64xf32, #tpu.memory_space<vmem>>, %arg4: memref<50x64xbf16, #tpu.memory_space<vmem>>) attributes {dimension_semantics = [#tpu.dimension_semantics<parallel>], iteration_bounds = array<i64: 1>, scalar_prefetch = 0 : i64, scratch_operands = 0 : i64, tpu.core_type = #tpu.core_type<tc>, window_params = [{transform_indices = @transform_0, window_bounds = array<i64: 50, 512>}, {pipeline_mode = #tpu.pipeline_mode<synchronous>, transform_indices = @transform_1, window_bounds = array<i64: 512, 64>}, {pipeline_mode = #tpu.pipeline_mode<synchronous>, transform_indices = @transform_2, window_bounds = array<i64: 1, 64>}, {transform_indices = @transform_3, window_bounds = array<i64: 50, 64>}]} {
    %c0 = arith.constant 0 : index
    %c0_0 = arith.constant 0 : index
    %0 = vector.load %arg1[%c0, %c0_0] : memref<50x512xbf16, #tpu.memory_space<vmem>>, vector<50x512xbf16>
    %c0_1 = arith.constant 0 : index
    %c0_2 = arith.constant 0 : index
    %1 = vector.load %arg2[%c0_1, %c0_2] : memref<512x64xbf16, #tpu.memory_space<vmem>>, vector<512x64xbf16>
    %cst = arith.constant dense<0.000000e+00> : vector<50x64xf32>
    %2 = tpu.matmul %0, %1, %cst {dimension_numbers = #tpu.dot_dimension_numbers<[1], [0], [0], [1], [0, 0, 1, 1], [], []>} : vector<50x512xbf16>, vector<512x64xbf16>, vector<50x64xf32> -> vector<50x64xf32>
    %c0_3 = arith.constant 0 : index
    %c0_4 = arith.constant 0 : index
    %3 = vector.load %arg3[%c0_3, %c0_4] : memref<1x64xf32, #tpu.memory_space<vmem>>, vector<1x64xf32>
    %4 = vector.broadcast %3 : vector<1x64xf32> to vector<50x64xf32>
    %5 = arith.addf %2, %4 : vector<50x64xf32>
    %cst_5 = arith.constant 0.000000e+00 : f32
    %6 = vector.broadcast %cst_5 : f32 to vector<50x64xf32>
    %7 = arith.maximumf %5, %6 : vector<50x64xf32>
    %8 = arith.truncf %7 : vector<50x64xf32> to vector<50x64xbf16>
    %c0_6 = arith.constant 0 : index
    %c0_7 = arith.constant 0 : index
    %9 = vector.load %arg4[%c0_6, %c0_7] : memref<50x64xbf16, #tpu.memory_space<vmem>>, vector<50x64xbf16>
    tpu.vector_store %arg4[%c0_6, %c0_7], %8 {strides = array<i32>} : memref<50x64xbf16, #tpu.memory_space<vmem>>, vector<50x64xbf16>,
    return
  }
  func.func @transform_0(%arg0: i32) -> (i32, i32) {
    %c0_i32 = arith.constant 0 : i32
    %c0_i32_0 = arith.constant 0 : i32
    return %arg0, %c0_i32 : i32, i32
  }
  func.func @transform_1(%arg0: i32) -> (i32, i32) {
    %c0_i32 = arith.constant 0 : i32
    %c0_i32_0 = arith.constant 0 : i32
    %c0_i32_1 = arith.constant 0 : i32
    return %c0_i32, %c0_i32_0 : i32, i32
  }
  func.func @transform_2(%arg0: i32) -> (i32, i32) {
    %c0_i32 = arith.constant 0 : i32
    %c0_i32_0 = arith.constant 0 : i32
    %c0_i32_1 = arith.constant 0 : i32
    return %c0_i32, %c0_i32_0 : i32, i32
  }
  func.func @transform_3(%arg0: i32) -> (i32, i32) {
    %c0_i32 = arith.constant 0 : i32
    %c0_i32_0 = arith.constant 0 : i32
    return %arg0, %c0_i32 : i32, i32
  }
}

module attributes {stable_mosaic.version = 11 : i64} {
  func.func @_matmul_bias_act_kernel(%arg0: i32, %arg1: memref<18x576xbf16, #tpu.memory_space<vmem>>, %arg2: memref<576x64xbf16, #tpu.memory_space<vmem>>, %arg3: memref<1x64xf32, #tpu.memory_space<vmem>>, %arg4: memref<18x64xbf16, #tpu.memory_space<vmem>>) attributes {dimension_semantics = [#tpu.dimension_semantics<parallel>], iteration_bounds = array<i64: 1>, scalar_prefetch = 0 : i64, scratch_operands = 0 : i64, tpu.core_type = #tpu.core_type<tc>, window_params = [{transform_indices = @transform_0, window_bounds = array<i64: 18, 576>}, {pipeline_mode = #tpu.pipeline_mode<synchronous>, transform_indices = @transform_1, window_bounds = array<i64: 576, 64>}, {pipeline_mode = #tpu.pipeline_mode<synchronous>, transform_indices = @transform_2, window_bounds = array<i64: 1, 64>}, {transform_indices = @transform_3, window_bounds = array<i64: 18, 64>}]} {
    %c0 = arith.constant 0 : index
    %c0_0 = arith.constant 0 : index
    %0 = vector.load %arg1[%c0, %c0_0] : memref<18x576xbf16, #tpu.memory_space<vmem>>, vector<18x576xbf16>
    %c0_1 = arith.constant 0 : index
    %c0_2 = arith.constant 0 : index
    %1 = vector.load %arg2[%c0_1, %c0_2] : memref<576x64xbf16, #tpu.memory_space<vmem>>, vector<576x64xbf16>
    %cst = arith.constant dense<0.000000e+00> : vector<18x64xf32>
    %2 = tpu.matmul %0, %1, %cst {dimension_numbers = #tpu.dot_dimension_numbers<[1], [0], [0], [1], [0, 0, 1, 1], [], []>} : vector<18x576xbf16>, vector<576x64xbf16>, vector<18x64xf32> -> vector<18x64xf32>
    %c0_3 = arith.constant 0 : index
    %c0_4 = arith.constant 0 : index
    %3 = vector.load %arg3[%c0_3, %c0_4] : memref<1x64xf32, #tpu.memory_space<vmem>>, vector<1x64xf32>
    %4 = vector.broadcast %3 : vector<1x64xf32> to vector<18x64xf32>
    %5 = arith.addf %2, %4 : vector<18x64xf32>
    %cst_5 = arith.constant 0.000000e+00 : f32
    %6 = vector.broadcast %cst_5 : f32 to vector<18x64xf32>
    %7 = arith.maximumf %5, %6 : vector<18x64xf32>
    %8 = arith.truncf %7 : vector<18x64xf32> to vector<18x64xbf16>
    %c0_6 = arith.constant 0 : index
    %c0_7 = arith.constant 0 : index
    %9 = vector.load %arg4[%c0_6, %c0_7] : memref<18x64xbf16, #tpu.memory_space<vmem>>, vector<18x64xbf16>
    tpu.vector_store %arg4[%c0_6, %c0_7], %8 {strides = array<i32>} : memref<18x64xbf16, #tpu.memory_space<vmem>>, vector<18x64xbf16>,
    return
  }
  func.func @transform_0(%arg0: i32) -> (i32, i32) {
    %c0_i32 = arith.constant 0 : i32
    %c0_i32_0 = arith.constant 0 : i32
    return %arg0, %c0_i32 : i32, i32
  }
  func.func @transform_1(%arg0: i32) -> (i32, i32) {
    %c0_i32 = arith.constant 0 : i32
    %c0_i32_0 = arith.constant 0 : i32
    %c0_i32_1 = arith.constant 0 : i32
    return %c0_i32, %c0_i32_0 : i32, i32
  }
  func.func @transform_2(%arg0: i32) -> (i32, i32) {
    %c0_i32 = arith.constant 0 : i32
    %c0_i32_0 = arith.constant 0 : i32
    %c0_i32_1 = arith.constant 0 : i32
    return %c0_i32, %c0_i32_0 : i32, i32
  }
  func.func @transform_3(%arg0: i32) -> (i32, i32) {
    %c0_i32 = arith.constant 0 : i32
    %c0_i32_0 = arith.constant 0 : i32
    return %arg0, %c0_i32 : i32, i32
  }
}

module attributes {stable_mosaic.version = 11 : i64} {
  func.func @_mlp_head_kernel(%arg0: i32, %arg1: memref<2x576xbf16, #tpu.memory_space<vmem>>, %arg2: memref<576x512xbf16, #tpu.memory_space<vmem>>, %arg3: memref<1x512xf32, #tpu.memory_space<vmem>>, %arg4: memref<512x128xbf16, #tpu.memory_space<vmem>>, %arg5: memref<1x128xf32, #tpu.memory_space<vmem>>, %arg6: memref<2x128xf32, #tpu.memory_space<vmem>>) attributes {dimension_semantics = [#tpu.dimension_semantics<parallel>], iteration_bounds = array<i64: 1>, scalar_prefetch = 0 : i64, scratch_operands = 0 : i64, tpu.core_type = #tpu.core_type<tc>, window_params = [{transform_indices = @transform_0, window_bounds = array<i64: 2, 576>}, {pipeline_mode = #tpu.pipeline_mode<synchronous>, transform_indices = @transform_1, window_bounds = array<i64: 576, 512>}, {pipeline_mode = #tpu.pipeline_mode<synchronous>, transform_indices = @transform_2, window_bounds = array<i64: 1, 512>}, {pipeline_mode = #tpu.pipeline_mode<synchronous>, transform_indices = @transform_3, window_bounds = array<i64: 512, 128>}, {pipeline_mode = #tpu.pipeline_mode<synchronous>, transform_indices = @transform_4, window_bounds = array<i64: 1, 128>}, {transform_indices = @transform_5, window_bounds = array<i64: 2, 128>}]} {
    %c0 = arith.constant 0 : index
    %c0_0 = arith.constant 0 : index
    %0 = vector.load %arg1[%c0, %c0_0] : memref<2x576xbf16, #tpu.memory_space<vmem>>, vector<2x576xbf16>
    %c0_1 = arith.constant 0 : index
    %c0_2 = arith.constant 0 : index
    %1 = vector.load %arg2[%c0_1, %c0_2] : memref<576x512xbf16, #tpu.memory_space<vmem>>, vector<576x512xbf16>
    %cst = arith.constant dense<0.000000e+00> : vector<2x512xf32>
    %2 = tpu.matmul %0, %1, %cst {dimension_numbers = #tpu.dot_dimension_numbers<[1], [0], [0], [1], [0, 0, 1, 1], [], []>} : vector<2x576xbf16>, vector<576x512xbf16>, vector<2x512xf32> -> vector<2x512xf32>
    %c0_3 = arith.constant 0 : index
    %c0_4 = arith.constant 0 : index
    %3 = vector.load %arg3[%c0_3, %c0_4] : memref<1x512xf32, #tpu.memory_space<vmem>>, vector<1x512xf32>
    %4 = vector.broadcast %3 : vector<1x512xf32> to vector<2x512xf32>
    %5 = arith.addf %2, %4 : vector<2x512xf32>
    %cst_5 = arith.constant 0.000000e+00 : f32
    %6 = vector.broadcast %cst_5 : f32 to vector<2x512xf32>
    %7 = arith.maximumf %5, %6 : vector<2x512xf32>
    %8 = arith.truncf %7 : vector<2x512xf32> to vector<2x512xbf16>
    %c0_6 = arith.constant 0 : index
    %c0_7 = arith.constant 0 : index
    %9 = vector.load %arg4[%c0_6, %c0_7] : memref<512x128xbf16, #tpu.memory_space<vmem>>, vector<512x128xbf16>
    %cst_8 = arith.constant dense<0.000000e+00> : vector<2x128xf32>
    %10 = tpu.matmul %8, %9, %cst_8 {dimension_numbers = #tpu.dot_dimension_numbers<[1], [0], [0], [1], [0, 0, 1, 1], [], []>} : vector<2x512xbf16>, vector<512x128xbf16>, vector<2x128xf32> -> vector<2x128xf32>
    %c0_9 = arith.constant 0 : index
    %c0_10 = arith.constant 0 : index
    %11 = vector.load %arg5[%c0_9, %c0_10] : memref<1x128xf32, #tpu.memory_space<vmem>>, vector<1x128xf32>
    %12 = vector.broadcast %11 : vector<1x128xf32> to vector<2x128xf32>
    %13 = arith.addf %10, %12 : vector<2x128xf32>
    %c0_11 = arith.constant 0 : index
    %c0_12 = arith.constant 0 : index
    %14 = vector.load %arg6[%c0_11, %c0_12] : memref<2x128xf32, #tpu.memory_space<vmem>>, vector<2x128xf32>
    tpu.vector_store %arg6[%c0_11, %c0_12], %13 {strides = array<i32>} : memref<2x128xf32, #tpu.memory_space<vmem>>, vector<2x128xf32>,
    return
  }
  func.func @transform_0(%arg0: i32) -> (i32, i32) {
    %c0_i32 = arith.constant 0 : i32
    %c0_i32_0 = arith.constant 0 : i32
    return %arg0, %c0_i32 : i32, i32
  }
  func.func @transform_1(%arg0: i32) -> (i32, i32) {
    %c0_i32 = arith.constant 0 : i32
    %c0_i32_0 = arith.constant 0 : i32
    %c0_i32_1 = arith.constant 0 : i32
    return %c0_i32, %c0_i32_0 : i32, i32
  }
  func.func @transform_2(%arg0: i32) -> (i32, i32) {
    %c0_i32 = arith.constant 0 : i32
    %c0_i32_0 = arith.constant 0 : i32
    %c0_i32_1 = arith.constant 0 : i32
    return %c0_i32, %c0_i32_0 : i32, i32
  }
  func.func @transform_3(%arg0: i32) -> (i32, i32) {
    %c0_i32 = arith.constant 0 : i32
    %c0_i32_0 = arith.constant 0 : i32
    %c0_i32_1 = arith.constant 0 : i32
    return %c0_i32, %c0_i32_0 : i32, i32
  }
  func.func @transform_4(%arg0: i32) -> (i32, i32) {
    %c0_i32 = arith.constant 0 : i32
    %c0_i32_0 = arith.constant 0 : i32
    %c0_i32_1 = arith.constant 0 : i32
    return %c0_i32, %c0_i32_0 : i32, i32
  }
  func.func @transform_5(%arg0: i32) -> (i32, i32) {
    %c0_i32 = arith.constant 0 : i32
    %c0_i32_0 = arith.constant 0 : i32
    return %arg0, %c0_i32 : i32, i32
  }
}

</mosaic_0001>

<bundles_post_ra>
// kernel: _lambda_.4
= control target key start
LH: loop header
LB: loop body
LE: loop exit
PB: predicated region body
PF: predicated region fallthrough
CT: control target
= control target key end

     0   :  { %s870_s12 = smov 0   ;;  %s1044_s0 = inlined_call_operand.vmem [shape: bf16[288,256], index: 0, kind: input, shape index: {}]   ;;  %s1045_s1 = inlined_call_operand.vmem [shape: bf16[256,32], index: 1, kind: input, shape index: {}]   ;;  %s1046_s2 = inlined_call_operand.vmem [shape: f32[1,32], index: 2, kind: input, shape index: {}]   ;;  %s1047_s3 = inlined_call_operand.vmem [shape: bf16[288,32], index: 3, kind: output, shape index: {}]  }
   0x1 LB: > { %s636_s13 = sadd.s32 4294967295, %s848_s12   ;;  %p640_p0 = scmp.ge.s32.totalorder %s848_s12, 1  ;;  %s848_s12 = sphi %s870_s12, %s13_s12  }
   0x2   : > { %p139_p1 = scmp.lt.s32.totalorder %s848_s12, 3 }
   0x4   : > { %p140_p2 = pnand %p640_p0, %p139_p1 }
   0x5   : > { %s164_s26 = smul.u32 (!%p140_p2), 18, %s636_s13 }
   0x6   : > { %143 = sbr.rel (%p140_p2) target bundleno = 256 (0x100), region = 32 }
   0x7   : > { %p165_p3 = scmp.lt.s32.totalorder (!%p140_p2), %s164_s26, 35 }
   0xb   : > { %v808_v0 = vld [vmem:[%s1045_s1 + $0x38] sm:$0xff]  ;;  %v807_v2 = vld [vmem:[%s1045_s1 + $0x30] sm:$0xff]  ;;  %v806_v4 = vld [vmem:[%s1045_s1 + $0x28] sm:$0xff]  ;;  %s1049_s26 = smov (!%p165_p3, %s164_s26), 35  ;;  %vm561_vm0 = vcmask 257024  }
   0xc   : > { %v816_v1 = vld [vmem:[%s1045_s1 + $0x78] sm:$0xff]  ;;  %417 = vmatpush.bf16.msra.mxu0 %v808_v0  ;;  %817 = vmatpush.bf16.msra.mxu2 %v808_v0  ;;  %v815_v3 = vld [vmem:[%s1045_s1 + $0x70] sm:$0xff]  ;;  %v814_v5 = vld [vmem:[%s1045_s1 + $0x68] sm:$0xff]  ;;  %s782_s13 = sshll.u32 %s1049_s26, 3  ;;  %s643_s28 = sshll.u32 %s1049_s26, 2 }
   0xd   : > { %471 = vmatpush.bf16.msra.mxu1 %v816_v1  ;;  %825 = vmatpush.bf16.msra.mxu3 %v816_v1  ;;  %v805_v6 = vld [vmem:[%s1045_s1 + $0x20] sm:$0xff]  ;;  %v804_v8 = vld [vmem:[%s1045_s1 + $0x18] sm:$0xff]  ;;  %v803_v10 = vld [vmem:[%s1045_s1 + $0x10] sm:$0xff]  ;;  %s923_s18 = scalar_lea.vmem %s1044_s0, %s782_s13  ;;  %s980_s4 = scalar_lea.vmem %s1047_s3, %s643_s28 }
   0xe   : > { %v813_v7 = vld [vmem:[%s1045_s1 + $0x60] sm:$0xff]  ;;  %v812_v9 = vld [vmem:[%s1045_s1 + $0x58] sm:$0xff]  ;;  %v811_v11 = vld [vmem:[%s1045_s1 + $0x50] sm:$0xff] }
   0xf   : > { %v802_v12 = vld [vmem:[%s1045_s1 + $0x8] sm:$0xff]  ;;  %v801_v14 = vld [vmem:[%s1045_s1] sm:$0xff]  ;;  %v793_v22 = vld [vmem:[%s923_s18 + $0x54] sm:$0xf] }
  0x10   : > { %418 = vmatpush.bf16.msra.mxu0 %v807_v2  ;;  %818 = vmatpush.bf16.msra.mxu2 %v807_v2  ;;  %v810_v13 = vld [vmem:[%s1045_s1 + $0x48] sm:$0xff]  ;;  %v809_v15 = vld [vmem:[%s1045_s1 + $0x40] sm:$0xff]  ;;  %v688_v23 = vld [vmem:[%s923_s18 + $0x58] sm:$0xf0] }
  0x11   : > { %472 = vmatpush.bf16.msra.mxu1 %v815_v3  ;;  %826 = vmatpush.bf16.msra.mxu3 %v815_v3  ;;  %v646_v16 = vld [vmem:[%s923_s18] sm:$0xf]  ;;  %v784_v17 = vld [vmem:[%s923_s18 + $0x4] sm:$0xf0]  ;;  %v783_v20 = vld [vmem:[%s923_s18 + $0x4] sm:$0xf]  ;;  %v691_v27 = vor.u32 %v793_v22, %v688_v23 }
  0x12   : > { %v678_v18 = vld [vmem:[%s923_s18 + $0x40] sm:$0xf]  ;;  %v792_v19 = vld [vmem:[%s923_s18 + $0x44] sm:$0xf0]  ;;  %v648_v21 = vld [vmem:[%s923_s18 + $0x8] sm:$0xf0]  ;;  %v647_v24 = vor.u32 %v784_v17, %v646_v16 }
  0x13   : > { %v679_v25 = vor.u32 %v792_v19, %v678_v18  ;;  %v651_v26 = vor.u32 %v783_v20, %v648_v21  ;;  %v654_v28 = vld [vmem:[%s923_s18 + $0x10] sm:$0xf]  ;;  %v786_v29 = vld [vmem:[%s923_s18 + $0x14] sm:$0xf0]  ;;  %v785_v32 = vld [vmem:[%s923_s18 + $0x14] sm:$0xf] }
  0x14   : > { %419 = vmatpush.bf16.msra.mxu0 %v806_v4  ;;  %819 = vmatpush.bf16.msra.mxu2 %v806_v4  ;;  %v686_v30 = vld [vmem:[%s923_s18 + $0x50] sm:$0xf]  ;;  %v794_v31 = vld [vmem:[%s923_s18 + $0x54] sm:$0xf0]  ;;  %v656_v33 = vld [vmem:[%s923_s18 + $0x18] sm:$0xf0]  ;;  %v655_v36 = vor.u32 %v786_v29, %v654_v28 }
  0x15   : > { %473 = vmatpush.bf16.msra.mxu1 %v814_v5  ;;  %827 = vmatpush.bf16.msra.mxu3 %v814_v5  ;;  %v795_v34 = vld [vmem:[%s923_s18 + $0x64] sm:$0xf]  ;;  %v696_v35 = vld [vmem:[%s923_s18 + $0x68] sm:$0xf0]  ;;  %v687_v37 = vor.u32 %v794_v31, %v686_v30  ;;  %v659_v38 = vor.u32 %v785_v32, %v656_v33  ;;  %v662_v40 = vld [vmem:[%s923_s18 + $0x20] sm:$0xf] }
  0x16   : > { %v699_v39 = vor.u32 %v795_v34, %v696_v35  ;;  %v788_v41 = vld [vmem:[%s923_s18 + $0x24] sm:$0xf0]  ;;  %v694_v42 = vld [vmem:[%s923_s18 + $0x60] sm:$0xf]  ;;  %v787_v44 = vld [vmem:[%s923_s18 + $0x24] sm:$0xf] }
  0x17   : > { %v796_v43 = vld [vmem:[%s923_s18 + $0x64] sm:$0xf0]  ;;  %v664_v45 = vld [vmem:[%s923_s18 + $0x28] sm:$0xf0]  ;;  %v797_v46 = vld [vmem:[%s923_s18 + $0x74] sm:$0xf]  ;;  %v663_v48 = vor.u32 %v788_v41, %v662_v40 }
  0x18   : > { %420 = vmatpush.bf16.msra.mxu0 %v805_v6  ;;  %820 = vmatpush.bf16.msra.mxu2 %v805_v6  ;;  %v704_v47 = vld [vmem:[%s923_s18 + $0x78] sm:$0xf0]  ;;  %v695_v49 = vor.u32 %v796_v43, %v694_v42  ;;  %v667_v50 = vor.u32 %v787_v44, %v664_v45  ;;  %v670_v52 = vld [vmem:[%s923_s18 + $0x30] sm:$0xf]  ;;  %v790_v53 = vld [vmem:[%s923_s18 + $0x34] sm:$0xf0] }
  0x19   : > { %474 = vmatpush.bf16.msra.mxu1 %v813_v7  ;;  %828 = vmatpush.bf16.msra.mxu3 %v813_v7  ;;  %v707_v51 = vor.u32 %v797_v46, %v704_v47  ;;  %v702_v54 = vld [vmem:[%s923_s18 + $0x70] sm:$0xf]  ;;  %v798_v55 = vld [vmem:[%s923_s18 + $0x74] sm:$0xf0]  ;;  %v789_v56 = vld [vmem:[%s923_s18 + $0x34] sm:$0xf]  ;;  %v671_v60 = vor.u32 %v790_v53, %v670_v52 }
  0x1a   : > { %v672_v57 = vld [vmem:[%s923_s18 + $0x38] sm:$0xf0]  ;;  %v799_v58 = vld [vmem:[%s923_s18 + $0x84] sm:$0xf]  ;;  %v712_v59 = vld [vmem:[%s923_s18 + $0x88] sm:$0xf0]  ;;  %v703_v61 = vor.u32 %v798_v55, %v702_v54 }
  0x1b   : > { %v675_v62 = vor.u32 %v789_v56, %v672_v57  ;;  %v715_v63 = vor.u32 %v799_v58, %v712_v59  ;;  %v710_v0 = vld [vmem:[%s923_s18 + $0x80] sm:$0xf]  ;;  %v800_v1 = vld [vmem:[%s923_s18 + $0x84] sm:$0xf0]  ;;  %v791_v2 = vld [vmem:[%s923_s18 + $0x44] sm:$0xf] }
  0x1c   : > { %421 = vmatpush.bf16.msra.mxu0 %v804_v8  ;;  %821 = vmatpush.bf16.msra.mxu2 %v804_v8  ;;  %v680_v3 = vld [vmem:[%s923_s18 + $0x48] sm:$0xf0]  ;;  %v711_v4 = vor.u32 %v800_v1, %v710_v0  ;;  %v973_v6 = vld [vmem:[%s1046_s2] ss:$0 sm:$0xff] }
  0x1d   : > { %475 = vmatpush.bf16.msra.mxu1 %v812_v9  ;;  %829 = vmatpush.bf16.msra.mxu3 %v812_v9  ;;  %v683_v5 = vor.u32 %v791_v2, %v680_v3 }
  0x20   : > { %422 = vmatpush.bf16.msra.mxu0 %v803_v10  ;;  %822 = vmatpush.bf16.msra.mxu2 %v803_v10 }
  0x21   : > { %476 = vmatpush.bf16.msra.mxu1 %v811_v11  ;;  %830 = vmatpush.bf16.msra.mxu3 %v811_v11 }
  0x24   : > { %423 = vmatpush.bf16.msra.mxu0 %v802_v12  ;;  %823 = vmatpush.bf16.msra.mxu2 %v802_v12 }
  0x25   : > { %477 = vmatpush.bf16.msra.mxu1 %v810_v13  ;;  %831 = vmatpush.bf16.msra.mxu3 %v810_v13 }
  0x28   : > { %424 = vmatpush.bf16.msra.mxu0 %v801_v14  ;;  %824 = vmatpush.bf16.msra.mxu2 %v801_v14 }
  0x29   : > { %478 = vmatpush.bf16.msra.mxu1 %v809_v15  ;;  %832 = vmatpush.bf16.msra.mxu3 %v809_v15 }
  0x2b   : > { %425 = vmatmul.bf16.vlgmr.msra.gmra.mxu0 %v647_v24  ;;  %445 = vmatmul.bf16.vlgmr.msra.gmra.mxu2 %v679_v25 }
  0x2c   : > { %479 = vmatmul.bf16.vlgmr.msra.gmra.mxu1 %v651_v26  ;;  %504 = vmatmul.bf16.vlgmr.msra.gmra.mxu3 %v691_v27 }
  0x3b   : > { %430 = vmatmul.bf16.gmra.mxu0 %v655_v36  ;;  %450 = vmatmul.bf16.gmra.mxu2 %v687_v37 }
  0x3c   : > { %484 = vmatmul.bf16.gmra.mxu1 %v659_v38  ;;  %509 = vmatmul.bf16.gmra.mxu3 %v699_v39 }
  0x4b   : > { %435 = vmatmul.bf16.gmra.mxu0 %v663_v48  ;;  %455 = vmatmul.bf16.gmra.mxu2 %v695_v49 }
  0x4c   : > { %489 = vmatmul.bf16.gmra.mxu1 %v667_v50  ;;  %514 = vmatmul.bf16.gmra.mxu3 %v707_v51 }
  0x5b   : > { %440 = vmatmul.bf16.gmra.mxu0 %v671_v60  ;;  %460 = vmatmul.bf16.gmra.mxu2 %v703_v61 }
  0x5c   : > { %494 = vmatmul.bf16.gmra.mxu1 %v675_v62  ;;  %519 = vmatmul.bf16.gmra.mxu3 %v715_v63 }
  0x6b   : > { %465 = vmatmul.bf16.gmra.mxu2 %v711_v4 }
  0x6c   : > { %499 = vmatmul.bf16.gmra.mxu1 %v683_v5 }
  0xa8   : > { %v426_v7 = vpop.f32.mrf.mxu0 }
  0xa9   : > { %v427_v8 = vadd.f32 %v973_v6, %v426_v7  ;;  %v480_v9 = vpop.f32.mrf.mxu1 }
  0xab   : > { %v481_v10 = vadd.f32 %v480_v9, %v427_v8 }
  0xad   : > { %v525_v11 = vmax.f32 %v481_v10, 0.0 }
  0xae   : > { %v982_v12 = vpop.f32.mrf.mxu2 }
  0xaf   : > { %v543_v13 = vpack.c.bf16 %v525_v11, %v525_v11  ;;  %v505_v17 = vpop.f32.mrf.mxu3 }
  0xb0   : > { %v428_v14 = vpop.f32.mrf.mxu0 }
  0xb1   : > { %562 = vst.msk [vmem:[%s980_s4] sm:$0xf] %vm561_vm0, %v543_v13  ;;  %v429_v15 = vadd.f32 %v973_v6, %v428_v14  ;;  %v482_v16 = vpop.f32.mrf.mxu1 }
  0xb3   : > { %v483_v18 = vadd.f32 %v482_v16, %v429_v15 }
  0xb5   : > { %v526_v19 = vmax.f32 %v483_v18, 0.0 }
  0xb6   : > { %v987_v20 = vpop.f32.mrf.mxu2 }
  0xb7   : > { %v544_v21 = vpack.c.bf16 %v526_v19, %v526_v19  ;;  %v507_v26 = vpop.f32.mrf.mxu3 }
  0xb8   : > { %v431_v22 = vpop.f32.mrf.mxu0 }
  0xb9   : > { %563 = vst.msk [vmem:[%s980_s4 + $0x4] sm:$0xf] %vm561_vm0, %v544_v21  ;;  %v432_v23 = vadd.f32 %v973_v6, %v431_v22  ;;  %v485_v24 = vpop.f32.mrf.mxu1 }
  0xbb   : > { %v486_v25 = vadd.f32 %v485_v24, %v432_v23 }
  0xbd   : > { %v527_v27 = vmax.f32 %v486_v25, 0.0 }
  0xbe   : > { %v451_v28 = vpop.f32.mrf.mxu2 }
  0xbf   : > { %v545_v29 = vpack.c.bf16 %v527_v27, %v527_v27  ;;  %v452_v30 = vadd.f32 %v973_v6, %v451_v28  ;;  %v510_v40 = vpop.f32.mrf.mxu3 }
  0xc0   : > { %v433_v31 = vpop.f32.mrf.mxu0 }
  0xc1   : > { %564 = vst.msk [vmem:[%s980_s4 + $0x8] sm:$0xf] %vm561_vm0, %v545_v29  ;;  %v506_v32 = vadd.f32 %v505_v17, %v452_v30  ;;  %v434_v33 = vadd.f32 %v973_v6, %v433_v31  ;;  %v487_v34 = vpop.f32.mrf.mxu1  ;;  %v447_v29 = vadd.f32 %v973_v6, %v982_v12  ;;  %v449_v12 = vadd.f32 %v973_v6, %v987_v20 }
  0xc3   : > { %v535_v35 = vmax.f32 %v506_v32, 0.0  ;;  %v488_v36 = vadd.f32 %v487_v34, %v434_v33 }
  0xc5   : > { %v553_v37 = vpack.c.bf16 %v535_v35, %v535_v35  ;;  %v528_v38 = vmax.f32 %v488_v36, 0.0 }
  0xc6   : > { %v453_v39 = vpop.f32.mrf.mxu2 }
  0xc7   : > { %572 = vst.msk [vmem:[%s980_s4 + $0x28] sm:$0xf] %vm561_vm0, %v553_v37  ;;  %v546_v41 = vpack.c.bf16 %v528_v38, %v528_v38  ;;  %v454_v42 = vadd.f32 %v973_v6, %v453_v39  ;;  %v512_v55 = vpop.f32.mrf.mxu3 }
  0xc8   : > { %v436_v43 = vpop.f32.mrf.mxu0 }
  0xc9   : > { %565 = vst.msk [vmem:[%s980_s4 + $0xc] sm:$0xf] %vm561_vm0, %v546_v41  ;;  %v508_v44 = vadd.f32 %v507_v26, %v454_v42  ;;  %v437_v45 = vadd.f32 %v973_v6, %v436_v43  ;;  %v490_v46 = vpop.f32.mrf.mxu1 }
  0xcb   : > { %v536_v47 = vmax.f32 %v508_v44, 0.0  ;;  %v491_v48 = vadd.f32 %v490_v46, %v437_v45 }
  0xcd   : > { %v554_v49 = vpack.c.bf16 %v536_v47, %v536_v47  ;;  %v529_v50 = vmax.f32 %v491_v48, 0.0 }
  0xce   : > { %v456_v51 = vpop.f32.mrf.mxu2 }
  0xcf   : > { %573 = vst.msk [vmem:[%s980_s4 + $0x2c] sm:$0xf] %vm561_vm0, %v554_v49  ;;  %v547_v52 = vpack.c.bf16 %v529_v50, %v529_v50  ;;  %v457_v53 = vadd.f32 %v973_v6, %v456_v51  ;;  %v515_v7 = vpop.f32.mrf.mxu3 }
  0xd0   : > { %v438_v54 = vpop.f32.mrf.mxu0 }
  0xd1   : > { %566 = vst.msk [vmem:[%s980_s4 + $0x10] sm:$0xf] %vm561_vm0, %v547_v52  ;;  %v511_v56 = vadd.f32 %v510_v40, %v457_v53  ;;  %v439_v57 = vadd.f32 %v973_v6, %v438_v54  ;;  %v492_v58 = vpop.f32.mrf.mxu1 }
  0xd3   : > { %v537_v59 = vmax.f32 %v511_v56, 0.0  ;;  %v493_v60 = vadd.f32 %v492_v58, %v439_v57 }
  0xd5   : > { %v555_v61 = vpack.c.bf16 %v537_v59, %v537_v59  ;;  %v530_v62 = vmax.f32 %v493_v60, 0.0 }
  0xd6   : > { %v458_v63 = vpop.f32.mrf.mxu2 }
  0xd7   : > { %574 = vst.msk [vmem:[%s980_s4 + $0x30] sm:$0xf] %vm561_vm0, %v555_v61  ;;  %v548_v0 = vpack.c.bf16 %v530_v62, %v530_v62  ;;  %v459_v1 = vadd.f32 %v973_v6, %v458_v63  ;;  %v517_v23 = vpop.f32.mrf.mxu3 }
  0xd8   : > { %v441_v2 = vpop.f32.mrf.mxu0 }
  0xd9   : > { %567 = vst.msk [vmem:[%s980_s4 + $0x14] sm:$0xf] %vm561_vm0, %v548_v0  ;;  %v513_v3 = vadd.f32 %v512_v55, %v459_v1  ;;  %v442_v4 = vadd.f32 %v973_v6, %v441_v2  ;;  %v495_v5 = vpop.f32.mrf.mxu1 }
  0xdb   : > { %v538_v8 = vmax.f32 %v513_v3, 0.0  ;;  %v496_v9 = vadd.f32 %v495_v5, %v442_v4 }
  0xdd   : > { %v556_v10 = vpack.c.bf16 %v538_v8, %v538_v8  ;;  %v531_v11 = vmax.f32 %v496_v9, 0.0 }
  0xde   : > { %v461_v13 = vpop.f32.mrf.mxu2 }
  0xdf   : > { %575 = vst.msk [vmem:[%s980_s4 + $0x34] sm:$0xf] %vm561_vm0, %v556_v10  ;;  %v549_v14 = vpack.c.bf16 %v531_v11, %v531_v11  ;;  %v462_v15 = vadd.f32 %v973_v6, %v461_v13  ;;  %v520_v37 = vpop.f32.mrf.mxu3 }
  0xe0   : > { %v443_v16 = vpop.f32.mrf.mxu0 }
  0xe1   : > { %568 = vst.msk [vmem:[%s980_s4 + $0x18] sm:$0xf] %vm561_vm0, %v549_v14  ;;  %v516_v17 = vadd.f32 %v515_v7, %v462_v15  ;;  %v444_v18 = vadd.f32 %v973_v6, %v443_v16  ;;  %v497_v19 = vpop.f32.mrf.mxu1 }
  0xe3   : > { %v539_v21 = vmax.f32 %v516_v17, 0.0  ;;  %v498_v22 = vadd.f32 %v497_v19, %v444_v18 }
  0xe5   : > { %v557_v24 = vpack.c.bf16 %v539_v21, %v539_v21  ;;  %v532_v25 = vmax.f32 %v498_v22, 0.0 }
  0xe6   : > { %v463_v26 = vpop.f32.mrf.mxu2 }
  0xe7   : > { %576 = vst.msk [vmem:[%s980_s4 + $0x38] sm:$0xf] %vm561_vm0, %v557_v24  ;;  %v550_v27 = vpack.c.bf16 %v532_v25, %v532_v25  ;;  %v464_v28 = vadd.f32 %v973_v6, %v463_v26  ;;  %v522_v49 = vpop.f32.mrf.mxu3 }
  0xe9   : > { %569 = vst.msk [vmem:[%s980_s4 + $0x1c] sm:$0xf] %vm561_vm0, %v550_v27  ;;  %v518_v30 = vadd.f32 %v517_v23, %v464_v28  ;;  %v500_v31 = vpop.f32.mrf.mxu1 }
  0xea   : > { %v501_v32 = vadd.f32 %v500_v31, %v447_v29 }
  0xeb   : > { %v540_v33 = vmax.f32 %v518_v30, 0.0 }
  0xec   : > { %v533_v34 = vmax.f32 %v501_v32, 0.0 }
  0xed   : > { %v558_v35 = vpack.c.bf16 %v540_v33, %v540_v33 }
  0xee   : > { %v551_v36 = vpack.c.bf16 %v533_v34, %v533_v34  ;;  %v466_v38 = vpop.f32.mrf.mxu2 }
  0xef   : > { %577 = vst.msk [vmem:[%s980_s4 + $0x3c] sm:$0xf] %vm561_vm0, %v558_v35  ;;  %v467_v39 = vadd.f32 %v973_v6, %v466_v38 }
  0xf0   : > { %570 = vst.msk [vmem:[%s980_s4 + $0x20] sm:$0xf] %vm561_vm0, %v551_v36 }
  0xf1   : > { %v521_v40 = vadd.f32 %v520_v37, %v467_v39  ;;  %v502_v41 = vpop.f32.mrf.mxu1 }
  0xf2   : > { %v503_v42 = vadd.f32 %v502_v41, %v449_v12 }
  0xf3   : > { %v541_v43 = vmax.f32 %v521_v40, 0.0 }
  0xf4   : > { %v534_v44 = vmax.f32 %v503_v42, 0.0 }
  0xf5   : > { %v559_v45 = vpack.c.bf16 %v541_v43, %v541_v43 }
  0xf6   : > { %v552_v46 = vpack.c.bf16 %v534_v44, %v534_v44  ;;  %v468_v47 = vpop.f32.mrf.mxu2 }
  0xf7   : > { %578 = vst.msk [vmem:[%s980_s4 + $0x40] sm:$0xf] %vm561_vm0, %v559_v45  ;;  %v469_v48 = vadd.f32 %v973_v6, %v468_v47 }
  0xf8   : > { %571 = vst.msk [vmem:[%s980_s4 + $0x24] sm:$0xf] %vm561_vm0, %v552_v46 }
  0xf9   : > { %v523_v50 = vadd.f32 %v522_v49, %v469_v48 }
  0xfb   : > { %v542_v20 = vmax.f32 %v523_v50, 0.0 }
  0xfd   : > { %v560_v51 = vpack.c.bf16 %v542_v20, %v542_v20 }
  0xff   : > { %579 = vst.msk [vmem:[%s980_s4 + $0x44] sm:$0xf] %vm561_vm0, %v560_v51 }
 0x100 PF: > { %s13_s12 = sadd.s32 1, %s848_s12  }
 0x101   : > { %p10_p4 = scmp.ge.s32.totalorder %s13_s12, 4  }
 0x103   :  { %12 = sbr.rel (!%p10_p4) target bundleno = 1 (0x1), region = 62 }

// kernel: _lambda_.5
= control target key start
LH: loop header
LB: loop body
LE: loop exit
PB: predicated region body
PF: predicated region fallthrough
CT: control target
= control target key end

     0   :  { %vm488_vm0 = vcmask 519168   ;;  %vm495_vm1 = vcmask 516096   ;;  %s955_s1 = inlined_call_operand.vmem [shape: bf16[512,64], index: 1, kind: input, shape index: {}]   ;;  %s956_s2 = inlined_call_operand.vmem [shape: f32[1,64], index: 2, kind: input, shape index: {}]   ;;  %s957_s0 = inlined_call_operand.vmem [shape: bf16[50,512], index: 0, kind: input, shape index: {}]   ;;  %s958_s3 = inlined_call_operand.vmem [shape: bf16[50,64], index: 3, kind: output, shape index: {}]  }
   0x1   :  { %v696_v0 = vld [vmem:[%s955_s1 + $0x38] sm:$0xff]  ;;  %v695_v4 = vld [vmem:[%s955_s1 + $0x30] sm:$0xff]  ;;  %v694_v8 = vld [vmem:[%s955_s1 + $0x28] sm:$0xff] }
   0x2   :  { %v704_v1 = vld [vmem:[%s955_s1 + $0x78] sm:$0xff]  ;;  %362 = vmatpush.bf16.msra.mxu0 %v696_v0  ;;  %v703_v5 = vld [vmem:[%s955_s1 + $0x70] sm:$0xff]  ;;  %v702_v9 = vld [vmem:[%s955_s1 + $0x68] sm:$0xff] }
   0x3   :  { %v712_v2 = vld [vmem:[%s955_s1 + $0xb8] sm:$0xff]  ;;  %390 = vmatpush.bf16.msra.mxu1 %v704_v1  ;;  %v711_v6 = vld [vmem:[%s955_s1 + $0xb0] sm:$0xff]  ;;  %v710_v10 = vld [vmem:[%s955_s1 + $0xa8] sm:$0xff] }
   0x4   :  { %v720_v3 = vld [vmem:[%s955_s1 + $0xf8] sm:$0xff]  ;;  %418 = vmatpush.bf16.msra.mxu2 %v712_v2  ;;  %v719_v7 = vld [vmem:[%s955_s1 + $0xf0] sm:$0xff]  ;;  %v718_v11 = vld [vmem:[%s955_s1 + $0xe8] sm:$0xff] }
   0x5   :  { %446 = vmatpush.bf16.msra.mxu3 %v720_v3  ;;  %v693_v12 = vld [vmem:[%s955_s1 + $0x20] sm:$0xff]  ;;  %v692_v16 = vld [vmem:[%s955_s1 + $0x18] sm:$0xff]  ;;  %v691_v20 = vld [vmem:[%s955_s1 + $0x10] sm:$0xff] }
   0x6   :  { %363 = vmatpush.bf16.msra.mxu0 %v695_v4  ;;  %v701_v13 = vld [vmem:[%s955_s1 + $0x60] sm:$0xff]  ;;  %v700_v17 = vld [vmem:[%s955_s1 + $0x58] sm:$0xff]  ;;  %v699_v21 = vld [vmem:[%s955_s1 + $0x50] sm:$0xff] }
   0x7   :  { %391 = vmatpush.bf16.msra.mxu1 %v703_v5  ;;  %v709_v14 = vld [vmem:[%s955_s1 + $0xa0] sm:$0xff]  ;;  %v708_v18 = vld [vmem:[%s955_s1 + $0x98] sm:$0xff]  ;;  %v707_v22 = vld [vmem:[%s955_s1 + $0x90] sm:$0xff] }
   0x8   :  { %419 = vmatpush.bf16.msra.mxu2 %v711_v6  ;;  %v717_v15 = vld [vmem:[%s955_s1 + $0xe0] sm:$0xff]  ;;  %v716_v19 = vld [vmem:[%s955_s1 + $0xd8] sm:$0xff]  ;;  %v715_v23 = vld [vmem:[%s955_s1 + $0xd0] sm:$0xff] }
   0x9   :  { %447 = vmatpush.bf16.msra.mxu3 %v719_v7  ;;  %v690_v24 = vld [vmem:[%s955_s1 + $0x8] sm:$0xff]  ;;  %v689_v28 = vld [vmem:[%s955_s1] sm:$0xff]  ;;  %v679_v33 = vld [vmem:[%s957_s0 + $0xc] sm:$0xf0] }
   0xa   :  { %364 = vmatpush.bf16.msra.mxu0 %v694_v8  ;;  %v698_v25 = vld [vmem:[%s955_s1 + $0x48] sm:$0xff]  ;;  %v697_v29 = vld [vmem:[%s955_s1 + $0x40] sm:$0xff]  ;;  %v505_v35 = vld [vmem:[%s957_s0 + $0x10] sm:$0xf0] }
   0xb   :  { %392 = vmatpush.bf16.msra.mxu1 %v702_v9  ;;  %v706_v26 = vld [vmem:[%s955_s1 + $0x88] sm:$0xff]  ;;  %v705_v30 = vld [vmem:[%s955_s1 + $0x80] sm:$0xff]  ;;  %v680_v37 = vld [vmem:[%s957_s0 + $0x14] sm:$0xf0] }
   0xc   :  { %420 = vmatpush.bf16.msra.mxu2 %v710_v10  ;;  %v714_v27 = vld [vmem:[%s955_s1 + $0xc8] sm:$0xff]  ;;  %v713_v31 = vld [vmem:[%s955_s1 + $0xc0] sm:$0xff]  ;;  %v513_v39 = vld [vmem:[%s957_s0 + $0x18] sm:$0xf0] }
   0xd   :  { %448 = vmatpush.bf16.msra.mxu3 %v718_v11  ;;  %v503_v32 = vld [vmem:[%s957_s0] sm:$0xf]  ;;  %v677_v34 = vld [vmem:[%s957_s0 + $0x4] sm:$0xf]  ;;  %v511_v36 = vld [vmem:[%s957_s0 + $0x8] sm:$0xf] }
   0xe   :  { %365 = vmatpush.bf16.msra.mxu0 %v693_v12  ;;  %v678_v38 = vld [vmem:[%s957_s0 + $0xc] sm:$0xf]  ;;  %v504_v40 = vor.u32 %v679_v33, %v503_v32  ;;  %v508_v41 = vor.u32 %v677_v34, %v505_v35  ;;  %v512_v42 = vor.u32 %v680_v37, %v511_v36  ;;  %v519_v44 = vld [vmem:[%s957_s0 + $0x20] sm:$0xf]  ;;  %v683_v45 = vld [vmem:[%s957_s0 + $0x2c] sm:$0xf0] }
   0xf   :  { %393 = vmatpush.bf16.msra.mxu1 %v701_v13  ;;  %v516_v43 = vor.u32 %v678_v38, %v513_v39  ;;  %v681_v46 = vld [vmem:[%s957_s0 + $0x24] sm:$0xf]  ;;  %v521_v47 = vld [vmem:[%s957_s0 + $0x30] sm:$0xf0]  ;;  %v527_v48 = vld [vmem:[%s957_s0 + $0x28] sm:$0xf]  ;;  %v520_v52 = vor.u32 %v683_v45, %v519_v44 }
  0x10   :  { %421 = vmatpush.bf16.msra.mxu2 %v709_v14  ;;  %v684_v49 = vld [vmem:[%s957_s0 + $0x34] sm:$0xf0]  ;;  %v682_v50 = vld [vmem:[%s957_s0 + $0x2c] sm:$0xf]  ;;  %v529_v51 = vld [vmem:[%s957_s0 + $0x38] sm:$0xf0]  ;;  %v524_v53 = vor.u32 %v681_v46, %v521_v47 }
  0x11   :  { %449 = vmatpush.bf16.msra.mxu3 %v717_v15  ;;  %v528_v54 = vor.u32 %v684_v49, %v527_v48  ;;  %v532_v55 = vor.u32 %v682_v50, %v529_v51  ;;  %v535_v56 = vld [vmem:[%s957_s0 + $0x40] sm:$0xf]  ;;  %v687_v57 = vld [vmem:[%s957_s0 + $0x4c] sm:$0xf0]  ;;  %v685_v58 = vld [vmem:[%s957_s0 + $0x44] sm:$0xf] }
  0x12   :  { %366 = vmatpush.bf16.msra.mxu0 %v692_v16  ;;  %v537_v59 = vld [vmem:[%s957_s0 + $0x50] sm:$0xf0]  ;;  %v543_v60 = vld [vmem:[%s957_s0 + $0x48] sm:$0xf]  ;;  %v688_v61 = vld [vmem:[%s957_s0 + $0x54] sm:$0xf0]  ;;  %v536_v0 = vor.u32 %v687_v57, %v535_v56 }
  0x13   :  { %394 = vmatpush.bf16.msra.mxu1 %v700_v17  ;;  %v686_v62 = vld [vmem:[%s957_s0 + $0x4c] sm:$0xf]  ;;  %v545_v63 = vld [vmem:[%s957_s0 + $0x58] sm:$0xf0]  ;;  %v540_v1 = vor.u32 %v685_v58, %v537_v59  ;;  %v544_v2 = vor.u32 %v688_v61, %v543_v60  ;;  %v26_v4 = vld [vmem:[%s957_s0 + $0x60] sm:$0x11] }
  0x14   :  { %422 = vmatpush.bf16.msra.mxu2 %v708_v18  ;;  %v548_v3 = vor.u32 %v686_v62, %v545_v63  ;;  %v27_v5 = vld [vmem:[%s957_s0 + $0x68] sm:$0x11]  ;;  %v134_v6 = vunpack.c.l.b16 %v26_v4  ;;  %v135_v7 = vunpack.c.h.b16 %v26_v4  ;;  %v919_v14 = vld [vmem:[%s956_s2] ss:$0 sm:$0xff] }
  0x15   :  { %450 = vmatpush.bf16.msra.mxu3 %v716_v19  ;;  %v136_v8 = vunpack.c.l.b16 %v27_v5  ;;  %v137_v9 = vunpack.c.h.b16 %v27_v5 }
  0x16   :  { %367 = vmatpush.bf16.msra.mxu0 %v691_v20  ;;  %v150_v10 = vpack.c.b16 %v134_v6, %v134_v6  ;;  %v151_v11 = vpack.c.b16 %v135_v7, %v135_v7 }
  0x17   :  { %395 = vmatpush.bf16.msra.mxu1 %v699_v21  ;;  %v152_v12 = vpack.c.b16 %v136_v8, %v136_v8  ;;  %v153_v13 = vpack.c.b16 %v137_v9, %v137_v9 }
  0x18   :  { %423 = vmatpush.bf16.msra.mxu2 %v707_v22 }
  0x19   :  { %451 = vmatpush.bf16.msra.mxu3 %v715_v23 }
  0x1a   :  { %368 = vmatpush.bf16.msra.mxu0 %v690_v24 }
  0x1b   :  { %396 = vmatpush.bf16.msra.mxu1 %v698_v25 }
  0x1c   :  { %424 = vmatpush.bf16.msra.mxu2 %v706_v26 }
  0x1d   :  { %452 = vmatpush.bf16.msra.mxu3 %v714_v27 }
  0x1e   :  { %369 = vmatpush.bf16.msra.mxu0 %v689_v28 }
  0x1f   :  { %397 = vmatpush.bf16.msra.mxu1 %v697_v29 }
  0x20   :  { %425 = vmatpush.bf16.msra.mxu2 %v705_v30 }
  0x21   :  { %453 = vmatpush.bf16.msra.mxu3 %v713_v31  ;;  %370 = vmatmul.bf16.vlgmr.msra.gmra.mxu0 %v504_v40 }
  0x22   :  { %398 = vmatmul.bf16.vlgmr.msra.gmra.mxu1 %v508_v41 }
  0x23   :  { %426 = vmatmul.bf16.vlgmr.msra.gmra.mxu2 %v512_v42 }
  0x24   :  { %454 = vmatmul.bf16.vlgmr.msra.gmra.mxu3 %v516_v43 }
  0x31   :  { %375 = vmatmul.bf16.gmra.mxu0 %v520_v52 }
  0x32   :  { %403 = vmatmul.bf16.gmra.mxu1 %v524_v53 }
  0x33   :  { %431 = vmatmul.bf16.gmra.mxu2 %v528_v54 }
  0x34   :  { %459 = vmatmul.bf16.gmra.mxu3 %v532_v55 }
  0x41   :  { %380 = vmatmul.bf16.gmra.mxu0 %v536_v0 }
  0x42   :  { %408 = vmatmul.bf16.gmra.mxu1 %v540_v1 }
  0x43   :  { %436 = vmatmul.bf16.gmra.mxu2 %v544_v2 }
  0x44   :  { %464 = vmatmul.bf16.gmra.mxu3 %v548_v3 }
  0x51   :  { %385 = vmatmul.bf16.gmra.mxu0 %v150_v10 }
  0x52   :  { %413 = vmatmul.bf16.gmra.mxu1 %v151_v11 }
  0x53   :  { %441 = vmatmul.bf16.gmra.mxu2 %v152_v12 }
  0x54   :  { %469 = vmatmul.bf16.gmra.mxu3 %v153_v13 }
  0x9e   :  { %v371_v15 = vpop.f32.mrf.mxu0 }
  0x9f   :  { %v399_v16 = vpop.f32.mrf.mxu1  ;;  %v372_v17 = vadd.f32 %v919_v14, %v371_v15 }
  0xa1   :  { %v400_v18 = vadd.f32 %v399_v16, %v372_v17 }
  0xa6   :  { %v427_v19 = vpop.f32.mrf.mxu2  ;;  %v373_v22 = vpop.f32.mrf.mxu0 }
  0xa7   :  { %v455_v20 = vpop.f32.mrf.mxu3  ;;  %v428_v21 = vadd.f32 %v427_v19, %v400_v18  ;;  %v401_v23 = vpop.f32.mrf.mxu1  ;;  %v374_v25 = vadd.f32 %v919_v14, %v373_v22 }
  0xa9   :  { %v456_v24 = vadd.f32 %v455_v20, %v428_v21  ;;  %v402_v28 = vadd.f32 %v401_v23, %v374_v25 }
  0xab   :  { %v474_v26 = vmax.f32 %v456_v24, 0.0 }
  0xad   :  { %v481_v27 = vpack.c.bf16 %v474_v26, %v474_v26 }
  0xae   :  { %v429_v29 = vpop.f32.mrf.mxu2  ;;  %v376_v32 = vpop.f32.mrf.mxu0 }
  0xaf   :  { %v457_v30 = vpop.f32.mrf.mxu3  ;;  %489 = vst.msk [vmem:[%s958_s3] sm:$0xf] %vm488_vm0, %v481_v27  ;;  %v430_v31 = vadd.f32 %v429_v29, %v402_v28  ;;  %v404_v33 = vpop.f32.mrf.mxu1  ;;  %v377_v34 = vadd.f32 %v919_v14, %v376_v32 }
  0xb1   :  { %v458_v35 = vadd.f32 %v457_v30, %v430_v31  ;;  %v405_v37 = vadd.f32 %v404_v33, %v377_v34 }
  0xb3   :  { %v475_v36 = vmax.f32 %v458_v35, 0.0 }
  0xb5   :  { %v482_v38 = vpack.c.bf16 %v475_v36, %v475_v36 }
  0xb6   :  { %v432_v39 = vpop.f32.mrf.mxu2  ;;  %v378_v42 = vpop.f32.mrf.mxu0 }
  0xb7   :  { %v460_v40 = vpop.f32.mrf.mxu3  ;;  %490 = vst.msk [vmem:[%s958_s3 + $0x4] sm:$0xf] %vm488_vm0, %v482_v38  ;;  %v433_v41 = vadd.f32 %v432_v39, %v405_v37  ;;  %v406_v43 = vpop.f32.mrf.mxu1  ;;  %v379_v45 = vadd.f32 %v919_v14, %v378_v42 }
  0xb9   :  { %v461_v44 = vadd.f32 %v460_v40, %v433_v41  ;;  %v407_v48 = vadd.f32 %v406_v43, %v379_v45 }
  0xbb   :  { %v476_v46 = vmax.f32 %v461_v44, 0.0 }
  0xbd   :  { %v483_v47 = vpack.c.bf16 %v476_v46, %v476_v46 }
  0xbe   :  { %v434_v49 = vpop.f32.mrf.mxu2  ;;  %v381_v52 = vpop.f32.mrf.mxu0 }
  0xbf   :  { %v462_v50 = vpop.f32.mrf.mxu3  ;;  %491 = vst.msk [vmem:[%s958_s3 + $0x8] sm:$0xf] %vm488_vm0, %v483_v47  ;;  %v435_v51 = vadd.f32 %v434_v49, %v407_v48  ;;  %v409_v53 = vpop.f32.mrf.mxu1  ;;  %v382_v54 = vadd.f32 %v919_v14, %v381_v52 }
  0xc1   :  { %v463_v55 = vadd.f32 %v462_v50, %v435_v51  ;;  %v410_v57 = vadd.f32 %v409_v53, %v382_v54 }
  0xc3   :  { %v477_v56 = vmax.f32 %v463_v55, 0.0 }
  0xc5   :  { %v484_v58 = vpack.c.bf16 %v477_v56, %v477_v56 }
  0xc6   :  { %v437_v59 = vpop.f32.mrf.mxu2  ;;  %v383_v62 = vpop.f32.mrf.mxu0 }
  0xc7   :  { %v465_v60 = vpop.f32.mrf.mxu3  ;;  %492 = vst.msk [vmem:[%s958_s3 + $0xc] sm:$0xf] %vm488_vm0, %v484_v58  ;;  %v438_v61 = vadd.f32 %v437_v59, %v410_v57  ;;  %v411_v63 = vpop.f32.mrf.mxu1  ;;  %v384_v1 = vadd.f32 %v919_v14, %v383_v62 }
  0xc9   :  { %v466_v0 = vadd.f32 %v465_v60, %v438_v61  ;;  %v412_v4 = vadd.f32 %v411_v63, %v384_v1 }
  0xcb   :  { %v478_v2 = vmax.f32 %v466_v0, 0.0 }
  0xcd   :  { %v485_v3 = vpack.c.bf16 %v478_v2, %v478_v2 }
  0xce   :  { %v439_v5 = vpop.f32.mrf.mxu2  ;;  %v386_v8 = vpop.f32.mrf.mxu0 }
  0xcf   :  { %v467_v6 = vpop.f32.mrf.mxu3  ;;  %493 = vst.msk [vmem:[%s958_s3 + $0x10] sm:$0xf] %vm488_vm0, %v485_v3  ;;  %v440_v7 = vadd.f32 %v439_v5, %v412_v4  ;;  %v414_v9 = vpop.f32.mrf.mxu1  ;;  %v387_v10 = vadd.f32 %v919_v14, %v386_v8 }
  0xd1   :  { %v468_v11 = vadd.f32 %v467_v6, %v440_v7  ;;  %v415_v13 = vadd.f32 %v414_v9, %v387_v10 }
  0xd3   :  { %v479_v12 = vmax.f32 %v468_v11, 0.0 }
  0xd5   :  { %v486_v15 = vpack.c.bf16 %v479_v12, %v479_v12 }
  0xd6   :  { %v442_v16 = vpop.f32.mrf.mxu2  ;;  %v388_v19 = vpop.f32.mrf.mxu0 }
  0xd7   :  { %v470_v17 = vpop.f32.mrf.mxu3  ;;  %494 = vst.msk [vmem:[%s958_s3 + $0x14] sm:$0xf] %vm488_vm0, %v486_v15  ;;  %v443_v18 = vadd.f32 %v442_v16, %v415_v13  ;;  %v416_v20 = vpop.f32.mrf.mxu1 }
  0xd9   :  { %v471_v21 = vadd.f32 %v470_v17, %v443_v18 }
  0xdb   :  { %v480_v22 = vmax.f32 %v471_v21, 0.0 }
  0xdd   :  { %v487_v23 = vpack.c.bf16 %v480_v22, %v480_v22 }
  0xde   :  { %v444_v24 = vpop.f32.mrf.mxu2 }
  0xdf   :  { %v472_v14 = vpop.f32.mrf.mxu3  ;;  %496 = vst.msk [vmem:[%s958_s3 + $0x18] sm:$0x1] %vm495_vm1, %v487_v23 }

// kernel: _lambda_.6
= control target key start
LH: loop header
LB: loop body
LE: loop exit
PB: predicated region body
PF: predicated region fallthrough
CT: control target
= control target key end

     0   :  { %vm358_vm0 = vcmask 523264   ;;  %vm461_vm1 = vcmask 519168   ;;  %vm464_vm2 = vcmask 516096   ;;  %s861_s1 = inlined_call_operand.vmem [shape: bf16[576,64], index: 1, kind: input, shape index: {}]   ;;  %s862_s2 = inlined_call_operand.vmem [shape: f32[1,64], index: 2, kind: input, shape index: {}]   ;;  %s863_s0 = inlined_call_operand.vmem [shape: bf16[18,576], index: 0, kind: input, shape index: {}]   ;;  %s864_s3 = inlined_call_operand.vmem [shape: bf16[18,64], index: 3, kind: output, shape index: {}]  }
   0x1   :  { %v648_v0 = vld [vmem:[%s861_s1 + $0x38] sm:$0xff]  ;;  %v647_v4 = vld [vmem:[%s861_s1 + $0x30] sm:$0xff]  ;;  %v646_v8 = vld [vmem:[%s861_s1 + $0x28] sm:$0xff] }
   0x2   :  { %v656_v1 = vld [vmem:[%s861_s1 + $0x78] sm:$0xff]  ;;  %365 = vmatpush.bf16.msra.mxu0 %v648_v0  ;;  %v655_v5 = vld [vmem:[%s861_s1 + $0x70] sm:$0xff]  ;;  %v654_v9 = vld [vmem:[%s861_s1 + $0x68] sm:$0xff] }
   0x3   :  { %v664_v2 = vld [vmem:[%s861_s1 + $0xb8] sm:$0xff]  ;;  %383 = vmatpush.bf16.msra.mxu1 %v656_v1  ;;  %v663_v6 = vld [vmem:[%s861_s1 + $0xb0] sm:$0xff]  ;;  %v662_v10 = vld [vmem:[%s861_s1 + $0xa8] sm:$0xff] }
   0x4   :  { %v672_v3 = vld [vmem:[%s861_s1 + $0xf8] sm:$0xff]  ;;  %401 = vmatpush.bf16.msra.mxu2 %v664_v2  ;;  %v671_v7 = vld [vmem:[%s861_s1 + $0xf0] sm:$0xff]  ;;  %v670_v11 = vld [vmem:[%s861_s1 + $0xe8] sm:$0xff] }
   0x5   :  { %419 = vmatpush.bf16.msra.mxu3 %v672_v3  ;;  %v645_v12 = vld [vmem:[%s861_s1 + $0x20] sm:$0xff]  ;;  %v644_v16 = vld [vmem:[%s861_s1 + $0x18] sm:$0xff]  ;;  %v643_v20 = vld [vmem:[%s861_s1 + $0x10] sm:$0xff] }
   0x6   :  { %366 = vmatpush.bf16.msra.mxu0 %v647_v4  ;;  %v653_v13 = vld [vmem:[%s861_s1 + $0x60] sm:$0xff]  ;;  %v652_v17 = vld [vmem:[%s861_s1 + $0x58] sm:$0xff]  ;;  %v651_v21 = vld [vmem:[%s861_s1 + $0x50] sm:$0xff] }
   0x7   :  { %384 = vmatpush.bf16.msra.mxu1 %v655_v5  ;;  %v661_v14 = vld [vmem:[%s861_s1 + $0xa0] sm:$0xff]  ;;  %v660_v18 = vld [vmem:[%s861_s1 + $0x98] sm:$0xff]  ;;  %v659_v22 = vld [vmem:[%s861_s1 + $0x90] sm:$0xff] }
   0x8   :  { %402 = vmatpush.bf16.msra.mxu2 %v663_v6  ;;  %v669_v15 = vld [vmem:[%s861_s1 + $0xe0] sm:$0xff]  ;;  %v668_v19 = vld [vmem:[%s861_s1 + $0xd8] sm:$0xff]  ;;  %v667_v23 = vld [vmem:[%s861_s1 + $0xd0] sm:$0xff] }
   0x9   :  { %420 = vmatpush.bf16.msra.mxu3 %v671_v7  ;;  %v642_v24 = vld [vmem:[%s861_s1 + $0x8] sm:$0xff]  ;;  %v641_v28 = vld [vmem:[%s861_s1] sm:$0xff]  ;;  %v638_v33 = vld [vmem:[%s863_s0 + $0x10] sm:$0xf0] }
   0xa   :  { %367 = vmatpush.bf16.msra.mxu0 %v646_v8  ;;  %v650_v25 = vld [vmem:[%s861_s1 + $0x48] sm:$0xff]  ;;  %v649_v29 = vld [vmem:[%s861_s1 + $0x40] sm:$0xff]  ;;  %v474_v35 = vld [vmem:[%s863_s0 + $0x14] sm:$0xf0] }
   0xb   :  { %385 = vmatpush.bf16.msra.mxu1 %v654_v9  ;;  %v658_v26 = vld [vmem:[%s861_s1 + $0x88] sm:$0xff]  ;;  %v657_v30 = vld [vmem:[%s861_s1 + $0x80] sm:$0xff]  ;;  %v639_v37 = vld [vmem:[%s863_s0 + $0x18] sm:$0xf0] }
   0xc   :  { %403 = vmatpush.bf16.msra.mxu2 %v662_v10  ;;  %v666_v27 = vld [vmem:[%s861_s1 + $0xc8] sm:$0xff]  ;;  %v665_v31 = vld [vmem:[%s861_s1 + $0xc0] sm:$0xff]  ;;  %v676_v40 = vld [vmem:[%s861_s1 + $0x118] sm:$0xff] }
   0xd   :  { %421 = vmatpush.bf16.msra.mxu3 %v670_v11  ;;  %v472_v32 = vld [vmem:[%s863_s0] sm:$0xf]  ;;  %v636_v34 = vld [vmem:[%s863_s0 + $0x4] sm:$0xf]  ;;  %v480_v36 = vld [vmem:[%s863_s0 + $0x8] sm:$0xf] }
   0xe   :  { %368 = vmatpush.bf16.msra.mxu0 %v645_v12  ;;  %v637_v38 = vld [vmem:[%s863_s0 + $0xc] sm:$0xf]  ;;  %v482_v39 = vld [vmem:[%s863_s0 + $0x1c] sm:$0xf0]  ;;  %v473_v41 = vor.u32 %v638_v33, %v472_v32  ;;  %v477_v42 = vor.u32 %v636_v34, %v474_v35  ;;  %v481_v43 = vor.u32 %v639_v37, %v480_v36  ;;  %v675_v45 = vld [vmem:[%s861_s1 + $0x110] sm:$0xff] }
   0xf   :  { %386 = vmatpush.bf16.msra.mxu1 %v653_v13  ;;  %v485_v44 = vor.u32 %v637_v38, %v482_v39  ;;  %v674_v46 = vld [vmem:[%s861_s1 + $0x108] sm:$0xff]  ;;  %v22_v48 = vld [vmem:[%s863_s0 + $0x30] sm:$0x11]  ;;  %v673_v49 = vld [vmem:[%s861_s1 + $0x100] sm:$0xff] }
  0x10   :  { %404 = vmatpush.bf16.msra.mxu2 %v661_v14  ;;  %v21_v47 = vld [vmem:[%s863_s0 + $0x28] sm:$0x11]  ;;  %v121_v52 = vunpack.c.l.b16 %v22_v48  ;;  %v122_v53 = vunpack.c.h.b16 %v22_v48  ;;  %v23_v58 = vld [vmem:[%s863_s0 + $0x38] sm:$0x1]  ;;  %v488_v60 = vld [vmem:[%s863_s0 + $0x10] sm:$0xf] }
  0x11   :  { %422 = vmatpush.bf16.msra.mxu3 %v669_v15  ;;  %v119_v50 = vunpack.c.l.b16 %v21_v47  ;;  %v120_v51 = vunpack.c.h.b16 %v21_v47  ;;  %v123_v59 = vunpack.c.l.b16 %v23_v58  ;;  %v640_v61 = vld [vmem:[%s863_s0 + $0x20] sm:$0xf0]  ;;  %v681_v10 = vld [vmem:[%s862_s2] ss:$0 sm:$0xff] }
  0x12   :  { %369 = vmatpush.bf16.msra.mxu0 %v644_v16  ;;  %v131_v56 = vpack.c.b16 %v121_v52, %v121_v52  ;;  %v132_v57 = vpack.c.b16 %v122_v53, %v122_v53  ;;  %v489_v62 = vor.u32 %v640_v61, %v488_v60 }
  0x13   :  { %387 = vmatpush.bf16.msra.mxu1 %v652_v17  ;;  %v129_v54 = vpack.c.b16 %v119_v50, %v119_v50  ;;  %v130_v55 = vpack.c.b16 %v120_v51, %v120_v51  ;;  %v133_v63 = vpack.c.b16 %v123_v59, %v123_v59 }
  0x14   :  { %405 = vmatpush.bf16.msra.mxu2 %v660_v18 }
  0x15   :  { %423 = vmatpush.bf16.msra.mxu3 %v668_v19 }
  0x16   :  { %370 = vmatpush.bf16.msra.mxu0 %v643_v20 }
  0x17   :  { %388 = vmatpush.bf16.msra.mxu1 %v651_v21 }
  0x18   :  { %406 = vmatpush.bf16.msra.mxu2 %v659_v22 }
  0x19   :  { %424 = vmatpush.bf16.msra.mxu3 %v667_v23 }
  0x1a   :  { %371 = vmatpush.bf16.msra.mxu0 %v642_v24 }
  0x1b   :  { %389 = vmatpush.bf16.msra.mxu1 %v650_v25 }
  0x1c   :  { %407 = vmatpush.bf16.msra.mxu2 %v658_v26 }
  0x1d   :  { %425 = vmatpush.bf16.msra.mxu3 %v666_v27 }
  0x1e   :  { %372 = vmatpush.bf16.msra.mxu0 %v641_v28 }
  0x1f   :  { %390 = vmatpush.bf16.msra.mxu1 %v649_v29 }
  0x20   :  { %408 = vmatpush.bf16.msra.mxu2 %v657_v30 }
  0x21   :  { %426 = vmatpush.bf16.msra.mxu3 %v665_v31  ;;  %373 = vmatmul.bf16.vlgmr.msra.gmra.mxu0 %v473_v41 }
  0x22   :  { %441 = vmatpush.bf16.msrb.mxu0 %v676_v40  ;;  %391 = vmatmul.bf16.vlgmr.msra.gmra.mxu1 %v477_v42 }
  0x23   :  { %677 = vmatpush.bf16.msrb.mxu1 %v676_v40  ;;  %409 = vmatmul.bf16.vlgmr.msra.gmra.mxu2 %v481_v43 }
  0x24   :  { %427 = vmatmul.bf16.vlgmr.msra.gmra.mxu3 %v485_v44 }
  0x26   :  { %442 = vmatpush.bf16.msrb.mxu0 %v675_v45 }
  0x27   :  { %678 = vmatpush.bf16.msrb.mxu1 %v675_v45 }
  0x2a   :  { %443 = vmatpush.bf16.msrb.mxu0 %v674_v46 }
  0x2b   :  { %679 = vmatpush.bf16.msrb.mxu1 %v674_v46 }
  0x2e   :  { %444 = vmatpush.bf16.msrb.mxu0 %v673_v49 }
  0x2f   :  { %680 = vmatpush.bf16.msrb.mxu1 %v673_v49 }
  0x31   :  { %378 = vmatmul.bf16.gmra.mxu0 %v129_v54 }
  0x32   :  { %396 = vmatmul.bf16.gmra.mxu1 %v130_v55 }
  0x33   :  { %414 = vmatmul.bf16.gmra.mxu2 %v131_v56 }
  0x34   :  { %432 = vmatmul.bf16.gmra.mxu3 %v132_v57 }
  0x41   :  { %634 = vmatmul.msk.bf16.vlgmr.msrb.gmra.mxu0 %vm358_vm0, %v489_v62 }
  0x42   :  { %635 = vmatmul.msk.bf16.vlgmr.msrb.gmra.mxu1 %vm358_vm0, %v133_v63 }
  0x9e   :  { %v374_v0 = vpop.f32.mrf.mxu0 }
  0x9f   :  { %v392_v1 = vpop.f32.mrf.mxu1  ;;  %v375_v11 = vadd.f32 %v681_v10, %v374_v0 }
  0xa1   :  { %v393_v17 = vadd.f32 %v392_v1, %v375_v11 }
  0xa6   :  { %v410_v2 = vpop.f32.mrf.mxu2  ;;  %v376_v4 = vpop.f32.mrf.mxu0 }
  0xa7   :  { %v428_v3 = vpop.f32.mrf.mxu3  ;;  %v394_v5 = vpop.f32.mrf.mxu1  ;;  %v411_v19 = vadd.f32 %v410_v2, %v393_v17  ;;  %v377_v21 = vadd.f32 %v681_v10, %v376_v4 }
  0xa9   :  { %v429_v22 = vadd.f32 %v428_v3, %v411_v19  ;;  %v395_v28 = vadd.f32 %v394_v5, %v377_v21 }
  0xae   :  { %v412_v6 = vpop.f32.mrf.mxu2  ;;  %v379_v8 = vpop.f32.mrf.mxu0 }
  0xaf   :  { %v430_v7 = vpop.f32.mrf.mxu3  ;;  %v397_v9 = vpop.f32.mrf.mxu1  ;;  %v380_v12 = vadd.f32 %v681_v10, %v379_v8  ;;  %v413_v31 = vadd.f32 %v412_v6, %v395_v28 }
  0xb1   :  { %v398_v18 = vadd.f32 %v397_v9, %v380_v12  ;;  %v431_v36 = vadd.f32 %v430_v7, %v413_v31 }
  0xb6   :  { %v415_v13 = vpop.f32.mrf.mxu2  ;;  %v381_v15 = vpop.f32.mrf.mxu0 }
  0xb7   :  { %v433_v14 = vpop.f32.mrf.mxu3  ;;  %v399_v16 = vpop.f32.mrf.mxu1  ;;  %v416_v20 = vadd.f32 %v415_v13, %v398_v18 }
  0xb9   :  { %v434_v23 = vadd.f32 %v433_v14, %v416_v20 }
  0xbe   :  { %v417_v24 = vpop.f32.mrf.mxu2  ;;  %v446_v26 = vpop.f32.mrf.mxu0 }
  0xbf   :  { %v435_v25 = vpop.f32.mrf.mxu3  ;;  %v451_v27 = vpop.f32.mrf.mxu1  ;;  %v447_v29 = vadd.f32 %v446_v26, %v429_v22 }
  0xc0   :  { %v452_v30 = vadd.f32 %v451_v27, %v434_v23 }
  0xc1   :  { %v455_v32 = vmax.f32 %v447_v29, 0.0 }
  0xc2   :  { %v457_v33 = vmax.f32 %v452_v30, 0.0 }
  0xc3   :  { %v458_v34 = vpack.c.bf16 %v455_v32, %v455_v32 }
  0xc4   :  { %v460_v35 = vpack.c.bf16 %v457_v33, %v457_v33 }
  0xc5   :  { %462 = vst.msk [vmem:[%s864_s3] sm:$0xf] %vm461_vm1, %v458_v34 }
  0xc6   :  { %465 = vst.msk [vmem:[%s864_s3 + $0x8] sm:$0x1] %vm464_vm2, %v460_v35  ;;  %v448_v37 = vpop.f32.mrf.mxu0 }
  0xc7   :  { %v453_v38 = vpop.f32.mrf.mxu1  ;;  %v449_v39 = vadd.f32 %v448_v37, %v431_v36 }
  0xc9   :  { %v456_v40 = vmax.f32 %v449_v39, 0.0 }
  0xcb   :  { %v459_v41 = vpack.c.bf16 %v456_v40, %v456_v40 }
  0xcd   :  { %463 = vst.msk [vmem:[%s864_s3 + $0x4] sm:$0xf] %vm461_vm1, %v459_v41 }

// kernel: _lambda_.7
= control target key start
LH: loop header
LB: loop body
LE: loop exit
PB: predicated region body
PF: predicated region fallthrough
CT: control target
= control target key end

     0   :  { %vm908_vm0 = vcmask 523264   ;;  %s3463_s0 = inlined_call_operand.vmem [shape: bf16[2,576], index: 0, kind: input, shape index: {}]   ;;  %s3464_s1 = inlined_call_operand.vmem [shape: bf16[576,512], index: 1, kind: input, shape index: {}]   ;;  %s3465_s2 = inlined_call_operand.vmem [shape: f32[1,512], index: 2, kind: input, shape index: {}]   ;;  %s3466_s3 = inlined_call_operand.vmem [shape: bf16[512,128], index: 3, kind: input, shape index: {}]   ;;  %s3467_s4 = inlined_call_operand.vmem [shape: f32[1,128], index: 4, kind: input, shape index: {}]   ;;  %s3468_s5 = inlined_call_operand.hbm [shape: f32[2,128], index: 5, kind: output, shape index: {}]  }
   0x1   :  { %v1622_v0 = vld [vmem:[%s3464_s1 + $0xe0] sm:$0xf]  ;;  %v2246_v1 = vld [vmem:[%s3464_s1 + $0xec] sm:$0xf0] }
   0x2   :  { %v1750_v2 = vld [vmem:[%s3464_s1 + $0x1e0] sm:$0xf]  ;;  %v1623_v3 = vor.u32 %v2246_v1, %v1622_v0  ;;  %v2278_v4 = vld [vmem:[%s3464_s1 + $0x1ec] sm:$0xf0] }
   0x3   :  { %v1878_v5 = vld [vmem:[%s3464_s1 + $0x2e0] sm:$0xf]  ;;  %v2310_v6 = vld [vmem:[%s3464_s1 + $0x2ec] sm:$0xf0]  ;;  %v1751_v7 = vor.u32 %v2278_v4, %v1750_v2 }
   0x4   :  { %v1879_v8 = vor.u32 %v2310_v6, %v1878_v5  ;;  %v2006_v9 = vld [vmem:[%s3464_s1 + $0x3e0] sm:$0xf]  ;;  %v2342_v10 = vld [vmem:[%s3464_s1 + $0x3ec] sm:$0xf0]  ;;  %911 = vmatpush.bf16.msra.mxu0 %v1623_v3 }
   0x5   :  { %v1606_v11 = vld [vmem:[%s3464_s1 + $0xc0] sm:$0xf]  ;;  %v2007_v12 = vor.u32 %v2342_v10, %v2006_v9  ;;  %v2242_v13 = vld [vmem:[%s3464_s1 + $0xcc] sm:$0xf0]  ;;  %924 = vmatpush.bf16.msra.mxu1 %v1751_v7 }
   0x6   :  { %v1734_v14 = vld [vmem:[%s3464_s1 + $0x1c0] sm:$0xf]  ;;  %v2274_v15 = vld [vmem:[%s3464_s1 + $0x1cc] sm:$0xf0]  ;;  %937 = vmatpush.bf16.msra.mxu2 %v1879_v8  ;;  %v1607_v16 = vor.u32 %v2242_v13, %v1606_v11 }
   0x7   :  { %v1735_v17 = vor.u32 %v2274_v15, %v1734_v14  ;;  %v1862_v18 = vld [vmem:[%s3464_s1 + $0x2c0] sm:$0xf]  ;;  %v2306_v19 = vld [vmem:[%s3464_s1 + $0x2cc] sm:$0xf0]  ;;  %950 = vmatpush.bf16.msra.mxu3 %v2007_v12 }
   0x8   :  { %v1990_v20 = vld [vmem:[%s3464_s1 + $0x3c0] sm:$0xf]  ;;  %v1863_v21 = vor.u32 %v2306_v19, %v1862_v18  ;;  %v2338_v22 = vld [vmem:[%s3464_s1 + $0x3cc] sm:$0xf0]  ;;  %912 = vmatpush.bf16.msra.mxu0 %v1607_v16 }
   0x9   :  { %v1590_v23 = vld [vmem:[%s3464_s1 + $0xa0] sm:$0xf]  ;;  %v2238_v24 = vld [vmem:[%s3464_s1 + $0xac] sm:$0xf0]  ;;  %v1991_v25 = vor.u32 %v2338_v22, %v1990_v20  ;;  %925 = vmatpush.bf16.msra.mxu1 %v1735_v17 }
   0xa   :  { %v1718_v26 = vld [vmem:[%s3464_s1 + $0x1a0] sm:$0xf]  ;;  %v2270_v27 = vld [vmem:[%s3464_s1 + $0x1ac] sm:$0xf0]  ;;  %v1591_v29 = vor.u32 %v2238_v24, %v1590_v23  ;;  %938 = vmatpush.bf16.msra.mxu2 %v1863_v21 }
   0xb   :  { %v1846_v28 = vld [vmem:[%s3464_s1 + $0x2a0] sm:$0xf]  ;;  %v2302_v30 = vld [vmem:[%s3464_s1 + $0x2ac] sm:$0xf0]  ;;  %v1719_v33 = vor.u32 %v2270_v27, %v1718_v26  ;;  %951 = vmatpush.bf16.msra.mxu3 %v1991_v25 }
   0xc   :  { %v1974_v31 = vld [vmem:[%s3464_s1 + $0x3a0] sm:$0xf]  ;;  %v2334_v32 = vld [vmem:[%s3464_s1 + $0x3ac] sm:$0xf0]  ;;  %v1847_v34 = vor.u32 %v2302_v30, %v1846_v28  ;;  %913 = vmatpush.bf16.msra.mxu0 %v1591_v29 }
   0xd   :  { %v1574_v35 = vld [vmem:[%s3464_s1 + $0x80] sm:$0xf]  ;;  %v2234_v36 = vld [vmem:[%s3464_s1 + $0x8c] sm:$0xf0]  ;;  %v1975_v38 = vor.u32 %v2334_v32, %v1974_v31  ;;  %926 = vmatpush.bf16.msra.mxu1 %v1719_v33  ;;  %v2244_v31 = vld [vmem:[%s3464_s1 + $0xe4] sm:$0xf] }
   0xe   :  { %v1702_v37 = vld [vmem:[%s3464_s1 + $0x180] sm:$0xf]  ;;  %v2266_v39 = vld [vmem:[%s3464_s1 + $0x18c] sm:$0xf0]  ;;  %v1575_v44 = vor.u32 %v2234_v36, %v1574_v35  ;;  %939 = vmatpush.bf16.msra.mxu2 %v1847_v34  ;;  %v1624_v33 = vld [vmem:[%s3464_s1 + $0xf0] sm:$0xf0] }
   0xf   :  { %v1830_v40 = vld [vmem:[%s3464_s1 + $0x280] sm:$0xf]  ;;  %v2298_v41 = vld [vmem:[%s3464_s1 + $0x28c] sm:$0xf0]  ;;  %v1703_v45 = vor.u32 %v2266_v39, %v1702_v37  ;;  %952 = vmatpush.bf16.msra.mxu3 %v1975_v38  ;;  %v2276_v34 = vld [vmem:[%s3464_s1 + $0x1e4] sm:$0xf] }
  0x10   :  { %v1958_v42 = vld [vmem:[%s3464_s1 + $0x380] sm:$0xf]  ;;  %v2330_v43 = vld [vmem:[%s3464_s1 + $0x38c] sm:$0xf0]  ;;  %v1831_v46 = vor.u32 %v2298_v41, %v1830_v40  ;;  %914 = vmatpush.bf16.msra.mxu0 %v1575_v44  ;;  %v1752_v35 = vld [vmem:[%s3464_s1 + $0x1f0] sm:$0xf0] }
  0x11   :  { %v1558_v47 = vld [vmem:[%s3464_s1 + $0x60] sm:$0xf]  ;;  %v2230_v48 = vld [vmem:[%s3464_s1 + $0x6c] sm:$0xf0]  ;;  %v1959_v50 = vor.u32 %v2330_v43, %v1958_v42  ;;  %927 = vmatpush.bf16.msra.mxu1 %v1703_v45  ;;  %v2308_v38 = vld [vmem:[%s3464_s1 + $0x2e4] sm:$0xf]  ;;  %v1627_v42 = vor.u32 %v2244_v31, %v1624_v33  ;;  %v1755_v43 = vor.u32 %v2276_v34, %v1752_v35 }
  0x12   :  { %v1686_v49 = vld [vmem:[%s3464_s1 + $0x160] sm:$0xf]  ;;  %v2262_v51 = vld [vmem:[%s3464_s1 + $0x16c] sm:$0xf0]  ;;  %v1559_v56 = vor.u32 %v2230_v48, %v1558_v47  ;;  %940 = vmatpush.bf16.msra.mxu2 %v1831_v46  ;;  %v1880_v39 = vld [vmem:[%s3464_s1 + $0x2f0] sm:$0xf0] }
  0x13   :  { %v1814_v52 = vld [vmem:[%s3464_s1 + $0x260] sm:$0xf]  ;;  %v2294_v53 = vld [vmem:[%s3464_s1 + $0x26c] sm:$0xf0]  ;;  %v1687_v57 = vor.u32 %v2262_v51, %v1686_v49  ;;  %953 = vmatpush.bf16.msra.mxu3 %v1959_v50  ;;  %v2240_v46 = vld [vmem:[%s3464_s1 + $0xc4] sm:$0xf]  ;;  %v1883_v47 = vor.u32 %v2308_v38, %v1880_v39 }
  0x14   :  { %v1942_v54 = vld [vmem:[%s3464_s1 + $0x360] sm:$0xf]  ;;  %v2326_v55 = vld [vmem:[%s3464_s1 + $0x36c] sm:$0xf0]  ;;  %v1815_v58 = vor.u32 %v2294_v53, %v1814_v52  ;;  %915 = vmatpush.bf16.msra.mxu0 %v1559_v56  ;;  %v1608_v48 = vld [vmem:[%s3464_s1 + $0xd0] sm:$0xf0] }
  0x15   :  { %v1542_v59 = vld [vmem:[%s3464_s1 + $0x40] sm:$0xf]  ;;  %v2226_v60 = vld [vmem:[%s3464_s1 + $0x4c] sm:$0xf0]  ;;  %v1943_v62 = vor.u32 %v2326_v55, %v1942_v54  ;;  %928 = vmatpush.bf16.msra.mxu1 %v1687_v57  ;;  %v2272_v49 = vld [vmem:[%s3464_s1 + $0x1c4] sm:$0xf] }
  0x16   :  { %v1670_v61 = vld [vmem:[%s3464_s1 + $0x140] sm:$0xf]  ;;  %v2258_v63 = vld [vmem:[%s3464_s1 + $0x14c] sm:$0xf0]  ;;  %v1543_v4 = vor.u32 %v2226_v60, %v1542_v59  ;;  %941 = vmatpush.bf16.msra.mxu2 %v1815_v58  ;;  %v1736_v50 = vld [vmem:[%s3464_s1 + $0x1d0] sm:$0xf0]  ;;  %v1611_v58 = vor.u32 %v2240_v46, %v1608_v48 }
  0x17   :  { %v1798_v0 = vld [vmem:[%s3464_s1 + $0x240] sm:$0xf]  ;;  %v2290_v1 = vld [vmem:[%s3464_s1 + $0x24c] sm:$0xf0]  ;;  %v1671_v5 = vor.u32 %v2258_v63, %v1670_v61  ;;  %954 = vmatpush.bf16.msra.mxu3 %v1943_v62  ;;  %v2304_v52 = vld [vmem:[%s3464_s1 + $0x2c4] sm:$0xf]  ;;  %v1739_v59 = vor.u32 %v2272_v49, %v1736_v50 }
  0x18   :  { %v1926_v2 = vld [vmem:[%s3464_s1 + $0x340] sm:$0xf]  ;;  %v2322_v3 = vld [vmem:[%s3464_s1 + $0x34c] sm:$0xf0]  ;;  %v1799_v6 = vor.u32 %v2290_v1, %v1798_v0  ;;  %916 = vmatpush.bf16.msra.mxu0 %v1543_v4  ;;  %v1864_v53 = vld [vmem:[%s3464_s1 + $0x2d0] sm:$0xf0] }
  0x19   :  { %v1526_v7 = vld [vmem:[%s3464_s1 + $0x20] sm:$0xf]  ;;  %v2222_v8 = vld [vmem:[%s3464_s1 + $0x2c] sm:$0xf0]  ;;  %v1927_v10 = vor.u32 %v2322_v3, %v1926_v2  ;;  %929 = vmatpush.bf16.msra.mxu1 %v1671_v5  ;;  %v2236_v61 = vld [vmem:[%s3464_s1 + $0xa4] sm:$0xf]  ;;  %v1867_v63 = vor.u32 %v2304_v52, %v1864_v53 }
  0x1a   :  { %v1654_v9 = vld [vmem:[%s3464_s1 + $0x120] sm:$0xf]  ;;  %v2254_v11 = vld [vmem:[%s3464_s1 + $0x12c] sm:$0xf0]  ;;  %v1527_v17 = vor.u32 %v2222_v8, %v1526_v7  ;;  %942 = vmatpush.bf16.msra.mxu2 %v1799_v6  ;;  %v1592_v0 = vld [vmem:[%s3464_s1 + $0xb0] sm:$0xf0] }
  0x1b   :  { %v1782_v12 = vld [vmem:[%s3464_s1 + $0x220] sm:$0xf]  ;;  %v2286_v13 = vld [vmem:[%s3464_s1 + $0x22c] sm:$0xf0]  ;;  %v1655_v21 = vor.u32 %v2254_v11, %v1654_v9  ;;  %955 = vmatpush.bf16.msra.mxu3 %v1927_v10  ;;  %v2268_v1 = vld [vmem:[%s3464_s1 + $0x1a4] sm:$0xf]  ;;  %v1595_v7 = vor.u32 %v2236_v61, %v1592_v0 }
  0x1c   :  { %v1910_v14 = vld [vmem:[%s3464_s1 + $0x320] sm:$0xf]  ;;  %v2318_v15 = vld [vmem:[%s3464_s1 + $0x32c] sm:$0xf0]  ;;  %v1783_v22 = vor.u32 %v2286_v13, %v1782_v12  ;;  %917 = vmatpush.bf16.msra.mxu0 %v1527_v17  ;;  %v1720_v2 = vld [vmem:[%s3464_s1 + $0x1b0] sm:$0xf0] }
  0x1d   :  { %v1510_v16 = vld [vmem:[%s3464_s1] sm:$0xf]  ;;  %v2218_v18 = vld [vmem:[%s3464_s1 + $0xc] sm:$0xf0]  ;;  %v1911_v26 = vor.u32 %v2318_v15, %v1910_v14  ;;  %930 = vmatpush.bf16.msra.mxu1 %v1655_v21  ;;  %v2300_v3 = vld [vmem:[%s3464_s1 + $0x2a4] sm:$0xf]  ;;  %v1723_v8 = vor.u32 %v2268_v1, %v1720_v2 }
  0x1e   :  { %v1638_v19 = vld [vmem:[%s3464_s1 + $0x100] sm:$0xf]  ;;  %v2250_v20 = vld [vmem:[%s3464_s1 + $0x10c] sm:$0xf0]  ;;  %v1511_v32 = vor.u32 %v2218_v18, %v1510_v16  ;;  %943 = vmatpush.bf16.msra.mxu2 %v1783_v22  ;;  %v1848_v4 = vld [vmem:[%s3464_s1 + $0x2b0] sm:$0xf0] }
  0x1f   :  { %v1766_v23 = vld [vmem:[%s3464_s1 + $0x200] sm:$0xf]  ;;  %v2282_v24 = vld [vmem:[%s3464_s1 + $0x20c] sm:$0xf0]  ;;  %v1639_v36 = vor.u32 %v2250_v20, %v1638_v19  ;;  %956 = vmatpush.bf16.msra.mxu3 %v1911_v26  ;;  %v2232_v10 = vld [vmem:[%s3464_s1 + $0x84] sm:$0xf]  ;;  %v1851_v12 = vor.u32 %v2300_v3, %v1848_v4 }
  0x20   :  { %v22_v25 = vld [vmem:[%s3463_s0] sm:$0x1f]  ;;  %v2314_v28 = vld [vmem:[%s3464_s1 + $0x30c] sm:$0xf0]  ;;  %v1767_v37 = vor.u32 %v2282_v24, %v1766_v23  ;;  %918 = vmatpush.bf16.msra.mxu0 %v1511_v32  ;;  %v1576_v11 = vld [vmem:[%s3464_s1 + $0x90] sm:$0xf0] }
  0x21   :  { %v1894_v27 = vld [vmem:[%s3464_s1 + $0x300] sm:$0xf]  ;;  %178 = vst [vmem:[#allocation1] ss:$9 sm:$0xff] %v22_v25  ;;  %v2358_v30 = vld [vmem:[%s3464_s1 + $0x46c] sm:$0xf0]  ;;  %931 = vmatpush.bf16.msra.mxu1 %v1639_v36  ;;  %v1579_v20 = vor.u32 %v2232_v10, %v1576_v11 }
  0x22   :  { %v2070_v29 = vld [vmem:[%s3464_s1 + $0x460] sm:$0xf]  ;;  %v1895_v40 = vor.u32 %v2314_v28, %v1894_v27  ;;  %v2354_v45 = vld [vmem:[%s3464_s1 + $0x44c] sm:$0xf0]  ;;  %944 = vmatpush.bf16.msra.mxu2 %v1767_v37  ;;  %v2264_v13 = vld [vmem:[%s3464_s1 + $0x184] sm:$0xf] }
  0x23   :  { %v2071_v41 = vor.u32 %v2358_v30, %v2070_v29  ;;  %v2054_v44 = vld [vmem:[%s3464_s1 + $0x440] sm:$0xf]  ;;  %v2350_v60 = vld [vmem:[%s3464_s1 + $0x42c] sm:$0xf0]  ;;  %v1704_v14 = vld [vmem:[%s3464_s1 + $0x190] sm:$0xf0] }
  0x24   :  { %957 = vmatpush.bf16.msra.mxu3 %v1895_v40  ;;  %v2055_v54 = vor.u32 %v2354_v45, %v2054_v44  ;;  %v2038_v56 = vld [vmem:[%s3464_s1 + $0x420] sm:$0xf]  ;;  %v2346_v9 = vld [vmem:[%s3464_s1 + $0x40c] sm:$0xf0]  ;;  %v2296_v15 = vld [vmem:[%s3464_s1 + $0x284] sm:$0xf]  ;;  %v1707_v21 = vor.u32 %v2264_v13, %v1704_v14 }
  0x25   :  { %967 = vmatpush.bf16.msrb.mxu0 %v2071_v41  ;;  %976 = vmatpush.bf16.msrb.mxu1 %v1627_v42  ;;  %v2039_v5 = vor.u32 %v2350_v60, %v2038_v56  ;;  %v2022_v6 = vld [vmem:[%s3464_s1 + $0x400] sm:$0xf]  ;;  %v1832_v16 = vld [vmem:[%s3464_s1 + $0x290] sm:$0xf0]  ;;  %v2340_v17 = vld [vmem:[%s3464_s1 + $0x3e4] sm:$0xf] }
  0x26   :  { %989 = vmatpush.bf16.msrb.mxu2 %v1755_v43  ;;  %v2008_v18 = vld [vmem:[%s3464_s1 + $0x3f0] sm:$0xf0]  ;;  %v2023_v19 = vor.u32 %v2346_v9, %v2022_v6  ;;  %v2228_v22 = vld [vmem:[%s3464_s1 + $0x64] sm:$0xf]  ;;  %v1835_v24 = vor.u32 %v2296_v15, %v1832_v16  ;;  %v1630_v11 = vld [vmem:[%s3464_s1 + $0xe8] sm:$0xf] }
  0x27   :  { %v1560_v23 = vld [vmem:[%s3464_s1 + $0x70] sm:$0xf0]  ;;  %v2011_v25 = vor.u32 %v2340_v17, %v2008_v18  ;;  %v2260_v26 = vld [vmem:[%s3464_s1 + $0x164] sm:$0xf]  ;;  %v1758_v15 = vld [vmem:[%s3464_s1 + $0x1e8] sm:$0xf] }
  0x28   :  { %v2688_v51 = vld [vmem:[#allocation1] sm:$0xff]  ;;  %v2696_v55 = vld [vmem:[#allocation1 + $0x12] sm:$0xff]  ;;  %v2709_v62 = vld [vmem:[#allocation1 + $0x9] sm:$0xff]  ;;  %1002 = vmatpush.bf16.msrb.mxu3 %v1883_v47  ;;  %v1563_v32 = vor.u32 %v2228_v22, %v1560_v23 }
  0x29   :  { %v2701_v57 = vld [vmem:[#allocation1 + $0x1b] sm:$0xff]  ;;  %919 = vmatmul.bf16.vlgmr.msra.gmra.mxu0 %v2688_v51  ;;  %945 = vmatmul.bf16.vlgmr.msra.gmra.mxu2 %v2696_v55  ;;  %v1688_v27 = vld [vmem:[%s3464_s1 + $0x170] sm:$0xf0]  ;;  %v2292_v28 = vld [vmem:[%s3464_s1 + $0x264] sm:$0xf] }
  0x2a   :  { %958 = vmatmul.bf16.vlgmr.msra.gmra.mxu3 %v2701_v57  ;;  %968 = vmatpush.bf16.msrb.mxu0 %v2055_v54  ;;  %v1816_v29 = vld [vmem:[%s3464_s1 + $0x270] sm:$0xf0]  ;;  %v2336_v30 = vld [vmem:[%s3464_s1 + $0x3c4] sm:$0xf]  ;;  %v1691_v33 = vor.u32 %v2260_v26, %v1688_v27  ;;  %v2279_v16 = vld [vmem:[%s3464_s1 + $0x1f4] sm:$0xf0] }
  0x2b   :  { %932 = vmatmul.bf16.vlgmr.msra.gmra.mxu1 %v2709_v62  ;;  %990 = vmatpush.bf16.msrb.mxu2 %v1739_v59  ;;  %v1992_v31 = vld [vmem:[%s3464_s1 + $0x3d0] sm:$0xf0]  ;;  %v2224_v34 = vld [vmem:[%s3464_s1 + $0x44] sm:$0xf]  ;;  %v1819_v36 = vor.u32 %v2292_v28, %v1816_v29  ;;  %v1614_v26 = vld [vmem:[%s3464_s1 + $0xc8] sm:$0xf] }
  0x2c   :  { %977 = vmatpush.bf16.msrb.mxu1 %v1611_v58  ;;  %1003 = vmatpush.bf16.msrb.mxu3 %v1867_v63  ;;  %v1544_v35 = vld [vmem:[%s3464_s1 + $0x50] sm:$0xf0]  ;;  %v1995_v37 = vor.u32 %v2336_v30, %v1992_v31  ;;  %v2256_v38 = vld [vmem:[%s3464_s1 + $0x144] sm:$0xf]  ;;  %v2243_v27 = vld [vmem:[%s3464_s1 + $0xd4] sm:$0xf0] }
  0x2d   :  { %v1672_v39 = vld [vmem:[%s3464_s1 + $0x150] sm:$0xf0]  ;;  %v2288_v40 = vld [vmem:[%s3464_s1 + $0x244] sm:$0xf]  ;;  %v1547_v45 = vor.u32 %v2224_v34, %v1544_v35  ;;  %v1742_v28 = vld [vmem:[%s3464_s1 + $0x1c8] sm:$0xf] }
  0x2e   :  { %969 = vmatpush.bf16.msrb.mxu0 %v2039_v5  ;;  %v1800_v41 = vld [vmem:[%s3464_s1 + $0x250] sm:$0xf0]  ;;  %v2332_v42 = vld [vmem:[%s3464_s1 + $0x3a4] sm:$0xf]  ;;  %v1675_v46 = vor.u32 %v2256_v38, %v1672_v39  ;;  %v2275_v29 = vld [vmem:[%s3464_s1 + $0x1d4] sm:$0xf0] }
  0x2f   :  { %991 = vmatpush.bf16.msrb.mxu2 %v1723_v8  ;;  %v1976_v43 = vld [vmem:[%s3464_s1 + $0x3b0] sm:$0xf0]  ;;  %v2220_v47 = vld [vmem:[%s3464_s1 + $0x24] sm:$0xf]  ;;  %v1803_v49 = vor.u32 %v2288_v40, %v1800_v41  ;;  %v1598_v38 = vld [vmem:[%s3464_s1 + $0xa8] sm:$0xf] }
  0x30   :  { %978 = vmatpush.bf16.msrb.mxu1 %v1595_v7  ;;  %1004 = vmatpush.bf16.msrb.mxu3 %v1851_v12  ;;  %v2808_v44 = vld [vmem:[#allocation1 + $0x24] sm:$0xff]  ;;  %v1979_v50 = vor.u32 %v2332_v42, %v1976_v43  ;;  %v2252_v52 = vld [vmem:[%s3464_s1 + $0x124] sm:$0xf]  ;;  %v1726_v40 = vld [vmem:[%s3464_s1 + $0x1a8] sm:$0xf] }
  0x31   :  { %v1528_v48 = vld [vmem:[%s3464_s1 + $0x30] sm:$0xf0]  ;;  %v2284_v54 = vld [vmem:[%s3464_s1 + $0x224] sm:$0xf]  ;;  %v2247_v12 = vld [vmem:[%s3464_s1 + $0xf4] sm:$0xf0] }
  0x32   :  { %970 = vmatpush.bf16.msrb.mxu0 %v2023_v19  ;;  %v1656_v53 = vld [vmem:[%s3464_s1 + $0x130] sm:$0xf0]  ;;  %v2328_v58 = vld [vmem:[%s3464_s1 + $0x384] sm:$0xf]  ;;  %v1531_v60 = vor.u32 %v2220_v47, %v1528_v48  ;;  %v2239_v39 = vld [vmem:[%s3464_s1 + $0xb4] sm:$0xf0] }
  0x33   :  { %992 = vmatpush.bf16.msrb.mxu2 %v1707_v21  ;;  %v1784_v56 = vld [vmem:[%s3464_s1 + $0x230] sm:$0xf0]  ;;  %v1659_v61 = vor.u32 %v2252_v52, %v1656_v53  ;;  %v2216_v63 = vld [vmem:[%s3464_s1 + $0x4] sm:$0xf]  ;;  %v2271_v41 = vld [vmem:[%s3464_s1 + $0x1b4] sm:$0xf0] }
  0x34   :  { %979 = vmatpush.bf16.msrb.mxu1 %v1579_v20  ;;  %1005 = vmatpush.bf16.msrb.mxu3 %v1835_v24  ;;  %v1960_v59 = vld [vmem:[%s3464_s1 + $0x390] sm:$0xf0]  ;;  %v2248_v1 = vld [vmem:[%s3464_s1 + $0x104] sm:$0xf]  ;;  %v1787_v2 = vor.u32 %v2284_v54, %v1784_v56  ;;  %v1631_v20 = vor.u32 %v2247_v12, %v1630_v11  ;;  %v1759_v24 = vor.u32 %v2279_v16, %v1758_v15  ;;  %v1582_v52 = vld [vmem:[%s3464_s1 + $0x88] sm:$0xf] }
  0x35   :  { %v1512_v0 = vld [vmem:[%s3464_s1 + $0x10] sm:$0xf0]  ;;  %v1963_v3 = vor.u32 %v2328_v58, %v1960_v59  ;;  %v2280_v5 = vld [vmem:[%s3464_s1 + $0x204] sm:$0xf]  ;;  %v2235_v53 = vld [vmem:[%s3464_s1 + $0x94] sm:$0xf0] }
  0x36   :  { %1015 = vmatpush.bf16.msra.mxu0 %v2011_v25  ;;  %v1640_v4 = vld [vmem:[%s3464_s1 + $0x110] sm:$0xf0]  ;;  %v2324_v7 = vld [vmem:[%s3464_s1 + $0x364] sm:$0xf]  ;;  %v1515_v13 = vor.u32 %v2216_v63, %v1512_v0  ;;  %v1710_v54 = vld [vmem:[%s3464_s1 + $0x188] sm:$0xf] }
  0x37   :  { %993 = vmatpush.bf16.msrb.mxu2 %v1691_v33  ;;  %v1768_v6 = vld [vmem:[%s3464_s1 + $0x210] sm:$0xf0]  ;;  %v2356_v9 = vld [vmem:[%s3464_s1 + $0x464] sm:$0xf]  ;;  %v1643_v14 = vor.u32 %v2248_v1, %v1640_v4  ;;  %v2267_v56 = vld [vmem:[%s3464_s1 + $0x194] sm:$0xf0]  ;;  %v1583_v1 = vor.u32 %v2235_v53, %v1582_v52 }
  0x38   :  { %980 = vmatpush.bf16.msrb.mxu1 %v1563_v32  ;;  %1006 = vmatpush.bf16.msrb.mxu3 %v1819_v36  ;;  %v1944_v8 = vld [vmem:[%s3464_s1 + $0x370] sm:$0xf0]  ;;  %v1771_v17 = vor.u32 %v2280_v5, %v1768_v6  ;;  %v2320_v21 = vld [vmem:[%s3464_s1 + $0x344] sm:$0xf]  ;;  %v1615_v32 = vor.u32 %v2243_v27, %v1614_v26  ;;  %v1743_v36 = vor.u32 %v2275_v29, %v1742_v28  ;;  %v1886_v58 = vld [vmem:[%s3464_s1 + $0x2e8] sm:$0xf] }
  0x39   :  { %2084 = vmatmul.msk.bf16.vlgmr.msrb.gmra.mxu0 %vm908_vm0, %v2808_v44  ;;  %v2072_v10 = vld [vmem:[%s3464_s1 + $0x470] sm:$0xf0]  ;;  %v1947_v18 = vor.u32 %v2324_v7, %v1944_v8  ;;  %v2352_v23 = vld [vmem:[%s3464_s1 + $0x444] sm:$0xf]  ;;  %v2311_v59 = vld [vmem:[%s3464_s1 + $0x2f4] sm:$0xf0] }
  0x3a   :  { %1016 = vmatpush.bf16.msra.mxu0 %v1995_v37  ;;  %v2075_v19 = vor.u32 %v2356_v9, %v2072_v10  ;;  %v1928_v22 = vld [vmem:[%s3464_s1 + $0x350] sm:$0xf0]  ;;  %v2316_v33 = vld [vmem:[%s3464_s1 + $0x324] sm:$0xf]  ;;  %v2343_v63 = vld [vmem:[%s3464_s1 + $0x3f4] sm:$0xf0] }
  0x3b   :  { %994 = vmatpush.bf16.msrb.mxu2 %v1675_v46  ;;  %v2056_v25 = vld [vmem:[%s3464_s1 + $0x450] sm:$0xf0]  ;;  %v1931_v30 = vor.u32 %v2320_v21, %v1928_v22  ;;  %v2348_v35 = vld [vmem:[%s3464_s1 + $0x424] sm:$0xf]  ;;  %v1599_v46 = vor.u32 %v2239_v39, %v1598_v38  ;;  %v1566_v4 = vld [vmem:[%s3464_s1 + $0x68] sm:$0xf] }
  0x3c   :  { %981 = vmatpush.bf16.msrb.mxu1 %v1547_v45  ;;  %1007 = vmatpush.bf16.msrb.mxu3 %v1803_v49  ;;  %v2059_v31 = vor.u32 %v2352_v23, %v2056_v25  ;;  %v1912_v34 = vld [vmem:[%s3464_s1 + $0x330] sm:$0xf0]  ;;  %v2312_v43 = vld [vmem:[%s3464_s1 + $0x304] sm:$0xf]  ;;  %v2231_v5 = vld [vmem:[%s3464_s1 + $0x74] sm:$0xf0] }
  0x3d   :  { %v2040_v37 = vld [vmem:[%s3464_s1 + $0x430] sm:$0xf0]  ;;  %v1915_v42 = vor.u32 %v2316_v33, %v1912_v34  ;;  %v2344_v48 = vld [vmem:[%s3464_s1 + $0x404] sm:$0xf]  ;;  %v1694_v6 = vld [vmem:[%s3464_s1 + $0x168] sm:$0xf] }
  0x3e   :  { %1017 = vmatpush.bf16.msra.mxu0 %v1979_v50  ;;  %v2043_v45 = vor.u32 %v2348_v35, %v2040_v37  ;;  %v1896_v47 = vld [vmem:[%s3464_s1 + $0x310] sm:$0xf0]  ;;  %v1727_v50 = vor.u32 %v2271_v41, %v1726_v40  ;;  %v2263_v8 = vld [vmem:[%s3464_s1 + $0x174] sm:$0xf0]  ;;  %v1870_v9 = vld [vmem:[%s3464_s1 + $0x2c8] sm:$0xf] }
  0x3f   :  { %995 = vmatpush.bf16.msrb.mxu2 %v1659_v61  ;;  %v2024_v49 = vld [vmem:[%s3464_s1 + $0x410] sm:$0xf0]  ;;  %v2014_v61 = vld [vmem:[%s3464_s1 + $0x3e8] sm:$0xf]  ;;  %v2307_v10 = vld [vmem:[%s3464_s1 + $0x2d4] sm:$0xf0] }
  0x40   :  { %982 = vmatpush.bf16.msrb.mxu1 %v1531_v60  ;;  %1008 = vmatpush.bf16.msrb.mxu3 %v1787_v2  ;;  %v1899_v60 = vor.u32 %v2312_v43, %v1896_v47  ;;  %v2027_v0 = vor.u32 %v2344_v48, %v2024_v49  ;;  %v1711_v2 = vor.u32 %v2267_v56, %v1710_v54  ;;  %v1998_v11 = vld [vmem:[%s3464_s1 + $0x3c8] sm:$0xf]  ;;  %v2339_v12 = vld [vmem:[%s3464_s1 + $0x3d4] sm:$0xf0] }
  0x41   :  { %v2015_v7 = vor.u32 %v2343_v63, %v2014_v61  ;;  %v1871_v15 = vor.u32 %v2307_v10, %v1870_v9  ;;  %v1550_v16 = vld [vmem:[%s3464_s1 + $0x48] sm:$0xf]  ;;  %v2303_v22 = vld [vmem:[%s3464_s1 + $0x2b4] sm:$0xf0] }
  0x42   :  { %1018 = vmatpush.bf16.msra.mxu0 %v1963_v3  ;;  %v1887_v3 = vor.u32 %v2311_v59, %v1886_v58  ;;  %v1854_v21 = vld [vmem:[%s3464_s1 + $0x2a8] sm:$0xf]  ;;  %v2223_v29 = vld [vmem:[%s3464_s1 + $0x34] sm:$0xf0] }
  0x43   :  { %996 = vmatpush.bf16.msrb.mxu2 %v1643_v14  ;;  %v1695_v14 = vor.u32 %v2263_v8, %v1694_v6  ;;  %v1982_v23 = vld [vmem:[%s3464_s1 + $0x3a8] sm:$0xf]  ;;  %v1855_v27 = vor.u32 %v2303_v22, %v1854_v21  ;;  %v2299_v34 = vld [vmem:[%s3464_s1 + $0x294] sm:$0xf0] }
  0x44   :  { %983 = vmatpush.bf16.msrb.mxu1 %v1515_v13  ;;  %1009 = vmatpush.bf16.msrb.mxu3 %v1771_v17  ;;  %v1567_v13 = vor.u32 %v2231_v5, %v1566_v4  ;;  %v2227_v17 = vld [vmem:[%s3464_s1 + $0x54] sm:$0xf0]  ;;  %v1534_v28 = vld [vmem:[%s3464_s1 + $0x28] sm:$0xf] }
  0x45   :  { %v1551_v25 = vor.u32 %v2227_v17, %v1550_v16  ;;  %v1838_v33 = vld [vmem:[%s3464_s1 + $0x288] sm:$0xf]  ;;  %v1535_v37 = vor.u32 %v2223_v29, %v1534_v28  ;;  %v2219_v39 = vld [vmem:[%s3464_s1 + $0x14] sm:$0xf0] }
  0x46   :  { %1019 = vmatpush.bf16.msra.mxu0 %v1947_v18  ;;  %997 = vmatmul.bf16.vlgmr.msrb.gmra.mxu2 %v2709_v62  ;;  %v1678_v18 = vld [vmem:[%s3464_s1 + $0x148] sm:$0xf]  ;;  %v2251_v43 = vld [vmem:[%s3464_s1 + $0x114] sm:$0xf0] }
  0x47   :  { %1041 = vmatpush.bf16.msra.mxu2 %v1631_v20  ;;  %984 = vmatmul.bf16.vlgmr.msrb.gmra.mxu1 %v2688_v51  ;;  %v2259_v20 = vld [vmem:[%s3464_s1 + $0x154] sm:$0xf0]  ;;  %v1966_v35 = vld [vmem:[%s3464_s1 + $0x388] sm:$0xf] }
  0x48   :  { %1032 = vmatpush.bf16.msra.mxu1 %v2075_v19  ;;  %1054 = vmatpush.bf16.msra.mxu3 %v1759_v24  ;;  %v1999_v19 = vor.u32 %v2339_v12, %v1998_v11  ;;  %v2335_v24 = vld [vmem:[%s3464_s1 + $0x3b4] sm:$0xf0]  ;;  %v1679_v26 = vor.u32 %v2259_v20, %v1678_v18  ;;  %v1518_v38 = vld [vmem:[%s3464_s1 + $0x8] sm:$0xf] }
  0x49   :  { %1010 = vmatmul.bf16.vlgmr.msrb.gmra.mxu3 %v2696_v55  ;;  %v1646_v40 = vld [vmem:[%s3464_s1 + $0x108] sm:$0xf]  ;;  %v2327_v49 = vld [vmem:[%s3464_s1 + $0x374] sm:$0xf0] }
  0x4a   :  { %1020 = vmatpush.bf16.msra.mxu0 %v1931_v30  ;;  %v1662_v30 = vld [vmem:[%s3464_s1 + $0x128] sm:$0xf]  ;;  %v2359_v52 = vld [vmem:[%s3464_s1 + $0x474] sm:$0xf0] }
  0x4b   :  { %1042 = vmatpush.bf16.msra.mxu2 %v1615_v32  ;;  %v2255_v32 = vld [vmem:[%s3464_s1 + $0x134] sm:$0xf0]  ;;  %v1950_v48 = vld [vmem:[%s3464_s1 + $0x368] sm:$0xf] }
  0x4c   :  { %1033 = vmatpush.bf16.msra.mxu1 %v2059_v31  ;;  %1055 = vmatpush.bf16.msra.mxu3 %v1743_v36  ;;  %v1983_v31 = vor.u32 %v2335_v24, %v1982_v23  ;;  %v2331_v36 = vld [vmem:[%s3464_s1 + $0x394] sm:$0xf0]  ;;  %v1663_v41 = vor.u32 %v2255_v32, %v1662_v30 }
  0x4d   :  { %v1967_v47 = vor.u32 %v2331_v36, %v1966_v35 }
  0x4e   :  { %1021 = vmatpush.bf16.msra.mxu0 %v1915_v42  ;;  %v1839_v42 = vor.u32 %v2299_v34, %v1838_v33 }
  0x4f   :  { %1043 = vmatpush.bf16.msra.mxu2 %v1599_v46  ;;  %v2295_v46 = vld [vmem:[%s3464_s1 + $0x274] sm:$0xf0] }
  0x50   :  { %1034 = vmatpush.bf16.msra.mxu1 %v2043_v45  ;;  %1056 = vmatpush.bf16.msra.mxu3 %v1727_v50  ;;  %v1822_v45 = vld [vmem:[%s3464_s1 + $0x268] sm:$0xf] }
  0x51   :  { %v2078_v50 = vld [vmem:[%s3464_s1 + $0x468] sm:$0xf] }
  0x52   :  { %1022 = vmatpush.bf16.msra.mxu0 %v1899_v60 }
  0x53   :  { %1044 = vmatpush.bf16.msra.mxu2 %v1583_v1 }
  0x54   :  { %1035 = vmatpush.bf16.msra.mxu1 %v2027_v0  ;;  %1057 = vmatpush.bf16.msra.mxu3 %v1711_v2 }
  0x55   :  { %1023 = vmatmul.bf16.vlgmr.msra.gmra.mxu0 %v2701_v57 }
  0x56   :  { %1067 = vmatpush.bf16.msrb.mxu0 %v1887_v3 }
  0x57   :  { %1045 = vmatpush.bf16.msra.mxu2 %v1567_v13  ;;  %2085 = vmatmul.msk.bf16.vlgmr.msra.gmra.mxu1 %vm908_vm0, %v2808_v44 }
  0x58   :  { %1080 = vmatpush.bf16.msrb.mxu1 %v2015_v7  ;;  %1058 = vmatpush.bf16.msra.mxu3 %v1695_v14 }
  0x5a   :  { %1068 = vmatpush.bf16.msrb.mxu0 %v1871_v15 }
  0x5b   :  { %1046 = vmatpush.bf16.msra.mxu2 %v1551_v25 }
  0x5c   :  { %1081 = vmatpush.bf16.msrb.mxu1 %v1999_v19  ;;  %1059 = vmatpush.bf16.msra.mxu3 %v1679_v26 }
  0x5e   :  { %1069 = vmatpush.bf16.msrb.mxu0 %v1855_v27 }
  0x60   :  { %1082 = vmatpush.bf16.msrb.mxu1 %v1983_v31 }
  0x61   :  { %10 = vsyncpa [#allocation3], 0  ;;  %1047 = vmatpush.bf16.msra.mxu2 %v1535_v37  ;;  %v1519_v53 = vor.u32 %v2219_v39, %v1518_v38  ;;  %v2245_v54 = vld [vmem:[%s3464_s1 + $0xec] sm:$0xf]  ;;  %v1632_v56 = vld [vmem:[%s3464_s1 + $0xf8] sm:$0xf0]  ;;  %1060 = vmatpush.bf16.msra.mxu3 %v1663_v41  ;;  %v1647_v58 = vor.u32 %v2251_v43, %v1646_v40  ;;  %v1823_v59 = vor.u32 %v2295_v46, %v1822_v45 }
  0x62   :  { %1070 = vmatpush.bf16.msrb.mxu0 %v1839_v42  ;;  %v1951_v60 = vor.u32 %v2327_v49, %v1950_v48  ;;  %v2079_v61 = vor.u32 %v2359_v52, %v2078_v50  ;;  %v1806_v63 = vld [vmem:[%s3464_s1 + $0x248] sm:$0xf]  ;;  %v2291_v0 = vld [vmem:[%s3464_s1 + $0x254] sm:$0xf0]  ;;  %v1635_v2 = vor.u32 %v2245_v54, %v1632_v56  ;;  %v2241_v6 = vld [vmem:[%s3464_s1 + $0xcc] sm:$0xf] }
  0x63   :  { %v1934_v1 = vld [vmem:[%s3464_s1 + $0x348] sm:$0xf]  ;;  %v2323_v3 = vld [vmem:[%s3464_s1 + $0x354] sm:$0xf0]  ;;  %v1616_v7 = vld [vmem:[%s3464_s1 + $0xd8] sm:$0xf0]  ;;  %v1807_v8 = vor.u32 %v2291_v0, %v1806_v63 }
  0x64   :  { %1083 = vmatpush.bf16.msrb.mxu1 %v1967_v47  ;;  %v2062_v4 = vld [vmem:[%s3464_s1 + $0x448] sm:$0xf]  ;;  %v2355_v5 = vld [vmem:[%s3464_s1 + $0x454] sm:$0xf0]  ;;  %v1935_v9 = vor.u32 %v2323_v3, %v1934_v1  ;;  %v1619_v14 = vor.u32 %v2241_v6, %v1616_v7  ;;  %v2237_v18 = vld [vmem:[%s3464_s1 + $0xac] sm:$0xf] }
  0x65   :  { %1048 = vmatpush.bf16.msra.mxu2 %v1519_v53  ;;  %1061 = vmatpush.bf16.msra.mxu3 %v1647_v58  ;;  %v2063_v10 = vor.u32 %v2355_v5, %v2062_v4  ;;  %v1790_v11 = vld [vmem:[%s3464_s1 + $0x228] sm:$0xf]  ;;  %v2287_v12 = vld [vmem:[%s3464_s1 + $0x234] sm:$0xf0]  ;;  %v1600_v19 = vld [vmem:[%s3464_s1 + $0xb8] sm:$0xf0] }
  0x66   :  { %1071 = vmatpush.bf16.msrb.mxu0 %v1823_v59  ;;  %v1918_v13 = vld [vmem:[%s3464_s1 + $0x328] sm:$0xf]  ;;  %v2319_v15 = vld [vmem:[%s3464_s1 + $0x334] sm:$0xf0]  ;;  %v1791_v20 = vor.u32 %v2287_v12, %v1790_v11  ;;  %v1603_v28 = vor.u32 %v2237_v18, %v1600_v19  ;;  %v2233_v30 = vld [vmem:[%s3464_s1 + $0x8c] sm:$0xf] }
  0x67   :  { %v2046_v16 = vld [vmem:[%s3464_s1 + $0x428] sm:$0xf]  ;;  %v2351_v17 = vld [vmem:[%s3464_s1 + $0x434] sm:$0xf0]  ;;  %v1919_v23 = vor.u32 %v2319_v15, %v1918_v13  ;;  %v1584_v31 = vld [vmem:[%s3464_s1 + $0x98] sm:$0xf0] }
  0x68   :  { %1084 = vmatpush.bf16.msrb.mxu1 %v1951_v60  ;;  %1049 = vmatmul.bf16.vlgmr.msra.gmra.mxu2 %v2688_v51  ;;  %v1774_v21 = vld [vmem:[%s3464_s1 + $0x208] sm:$0xf]  ;;  %v2283_v22 = vld [vmem:[%s3464_s1 + $0x214] sm:$0xf0]  ;;  %v2047_v24 = vor.u32 %v2351_v17, %v2046_v16  ;;  %v2277_v32 = vld [vmem:[%s3464_s1 + $0x1ec] sm:$0xf]  ;;  %v1587_v41 = vor.u32 %v2233_v30, %v1584_v31 }
  0x69   :  { %1097 = vmatpush.bf16.msrb.mxu2 %v2079_v61  ;;  %1106 = vmatpush.bf16.msrb.mxu3 %v1635_v2  ;;  %v1902_v25 = vld [vmem:[%s3464_s1 + $0x308] sm:$0xf]  ;;  %v2315_v26 = vld [vmem:[%s3464_s1 + $0x314] sm:$0xf0]  ;;  %v1760_v33 = vld [vmem:[%s3464_s1 + $0x1f8] sm:$0xf0]  ;;  %v1775_v35 = vor.u32 %v2283_v22, %v1774_v21 }
  0x6a   :  { %1062 = vmatmul.bf16.vlgmr.msra.gmra.mxu3 %v2709_v62  ;;  %1072 = vmatpush.bf16.msrb.mxu0 %v1807_v8  ;;  %v2030_v27 = vld [vmem:[%s3464_s1 + $0x408] sm:$0xf]  ;;  %v2347_v29 = vld [vmem:[%s3464_s1 + $0x414] sm:$0xf0]  ;;  %v2309_v34 = vld [vmem:[%s3464_s1 + $0x2ec] sm:$0xf]  ;;  %v1903_v39 = vor.u32 %v2315_v26, %v1902_v25  ;;  %v1763_v42 = vor.u32 %v2277_v32, %v1760_v33 }
  0x6b   :  { %v1888_v36 = vld [vmem:[%s3464_s1 + $0x2f8] sm:$0xf0]  ;;  %v2341_v37 = vld [vmem:[%s3464_s1 + $0x3ec] sm:$0xf]  ;;  %v2031_v40 = vor.u32 %v2347_v29, %v2030_v27  ;;  %s2420_s13 = smov [#allocation2]   ;;  %s1499_s17 = sshll.u32 %s3468_s5, 4  ;;  %s1500_s17 = int_to_ptr.hbm [resolvable:$true] %s1499_s17 }
  0x6c   :  { %1085 = vmatpush.bf16.msrb.mxu1 %v1935_v9  ;;  %v2016_v38 = vld [vmem:[%s3464_s1 + $0x3f8] sm:$0xf0]  ;;  %v2229_v43 = vld [vmem:[%s3464_s1 + $0x6c] sm:$0xf]  ;;  %v1891_v46 = vor.u32 %v2309_v34, %v1888_v36  ;;  %s1497_s14 = sshll.u32 %s2420_s13, 4  ;;  %s1498_s14 = int_to_ptr.vmem [resolvable:$true] %s1497_s14 }
  0x6d   :  { %1098 = vmatpush.bf16.msrb.mxu2 %v2063_v10  ;;  %1107 = vmatpush.bf16.msrb.mxu3 %v1619_v14  ;;  %v1568_v45 = vld [vmem:[%s3464_s1 + $0x78] sm:$0xf0]  ;;  %v2019_v47 = vor.u32 %v2341_v37, %v2016_v38  ;;  %v2273_v48 = vld [vmem:[%s3464_s1 + $0x1cc] sm:$0xf] }
  0x6e   :  { %1073 = vmatpush.bf16.msrb.mxu0 %v1791_v20  ;;  %v1744_v49 = vld [vmem:[%s3464_s1 + $0x1d8] sm:$0xf0]  ;;  %v2305_v50 = vld [vmem:[%s3464_s1 + $0x2cc] sm:$0xf]  ;;  %v1571_v56 = vor.u32 %v2229_v43, %v1568_v45 }
  0x6f   :  { %v1872_v52 = vld [vmem:[%s3464_s1 + $0x2d8] sm:$0xf0]  ;;  %v2337_v53 = vld [vmem:[%s3464_s1 + $0x3cc] sm:$0xf]  ;;  %v1747_v58 = vor.u32 %v2273_v48, %v1744_v49 }
  0x70   :  { %1086 = vmatpush.bf16.msrb.mxu1 %v1919_v23  ;;  %v2000_v54 = vld [vmem:[%s3464_s1 + $0x3d8] sm:$0xf0]  ;;  %v2225_v59 = vld [vmem:[%s3464_s1 + $0x4c] sm:$0xf]  ;;  %v1875_v61 = vor.u32 %v2305_v50, %v1872_v52 }
  0x71   :  { %1099 = vmatpush.bf16.msrb.mxu2 %v2047_v24  ;;  %1108 = vmatpush.bf16.msrb.mxu3 %v1603_v28  ;;  %v1552_v60 = vld [vmem:[%s3464_s1 + $0x58] sm:$0xf0]  ;;  %v2003_v63 = vor.u32 %v2337_v53, %v2000_v54  ;;  %v2269_v0 = vld [vmem:[%s3464_s1 + $0x1ac] sm:$0xf] }
  0x72   :  { %1074 = vmatpush.bf16.msrb.mxu0 %v1775_v35  ;;  %v1728_v1 = vld [vmem:[%s3464_s1 + $0x1b8] sm:$0xf0]  ;;  %v2301_v2 = vld [vmem:[%s3464_s1 + $0x2ac] sm:$0xf]  ;;  %v1555_v6 = vor.u32 %v2225_v59, %v1552_v60 }
  0x73   :  { %v1856_v3 = vld [vmem:[%s3464_s1 + $0x2b8] sm:$0xf0]  ;;  %v2333_v4 = vld [vmem:[%s3464_s1 + $0x3ac] sm:$0xf]  ;;  %v1731_v7 = vor.u32 %v2269_v0, %v1728_v1 }
  0x74   :  { %1087 = vmatpush.bf16.msrb.mxu1 %v1903_v39  ;;  %v1984_v5 = vld [vmem:[%s3464_s1 + $0x3b8] sm:$0xf0]  ;;  %v2221_v8 = vld [vmem:[%s3464_s1 + $0x2c] sm:$0xf]  ;;  %v1859_v10 = vor.u32 %v2301_v2, %v1856_v3 }
  0x75   :  { %1100 = vmatpush.bf16.msrb.mxu2 %v2031_v40  ;;  %1109 = vmatpush.bf16.msrb.mxu3 %v1587_v41  ;;  %v1536_v9 = vld [vmem:[%s3464_s1 + $0x38] sm:$0xf0]  ;;  %v1987_v11 = vor.u32 %v2333_v4, %v1984_v5  ;;  %v2265_v12 = vld [vmem:[%s3464_s1 + $0x18c] sm:$0xf] }
  0x76   :  { %1119 = vmatpush.bf16.msra.mxu0 %v1763_v42  ;;  %v1712_v13 = vld [vmem:[%s3464_s1 + $0x198] sm:$0xf0]  ;;  %v2297_v14 = vld [vmem:[%s3464_s1 + $0x28c] sm:$0xf]  ;;  %v1539_v18 = vor.u32 %v2221_v8, %v1536_v9 }
  0x77   :  { %1075 = vmatmul.bf16.vlgmr.msrb.gmra.mxu0 %v2696_v55  ;;  %1088 = vmatmul.bf16.vlgmr.msrb.gmra.mxu1 %v2701_v57  ;;  %v1840_v15 = vld [vmem:[%s3464_s1 + $0x298] sm:$0xf0]  ;;  %v2329_v16 = vld [vmem:[%s3464_s1 + $0x38c] sm:$0xf]  ;;  %v1715_v19 = vor.u32 %v2265_v12, %v1712_v13 }
  0x78   :  { %1132 = vmatpush.bf16.msra.mxu1 %v1891_v46  ;;  %2086 = vmatmul.msk.bf16.vlgmr.msrb.gmra.mxu2 %vm908_vm0, %v2808_v44  ;;  %v1968_v17 = vld [vmem:[%s3464_s1 + $0x398] sm:$0xf0]  ;;  %v2217_v20 = vld [vmem:[%s3464_s1 + $0xc] sm:$0xf]  ;;  %v1843_v22 = vor.u32 %v2297_v14, %v1840_v15  ;;  %v2366_v14 = vld [vmem:[%s3466_s3 + $0x30] sm:$0xff] }
  0x79   :  { %1145 = vmatpush.bf16.msra.mxu2 %v2019_v47  ;;  %1110 = vmatpush.bf16.msrb.mxu3 %v1571_v56  ;;  %v1520_v21 = vld [vmem:[%s3464_s1 + $0x18] sm:$0xf0]  ;;  %v1971_v23 = vor.u32 %v2329_v16, %v1968_v17  ;;  %v2261_v24 = vld [vmem:[%s3464_s1 + $0x16c] sm:$0xf]  ;;  %v2364_v16 = vld [vmem:[%s3466_s3 + $0x20] sm:$0xff] }
  0x7a   :  { %1120 = vmatpush.bf16.msra.mxu0 %v1747_v58  ;;  %v1696_v25 = vld [vmem:[%s3464_s1 + $0x178] sm:$0xf0]  ;;  %v2293_v26 = vld [vmem:[%s3464_s1 + $0x26c] sm:$0xf]  ;;  %v1523_v32 = vor.u32 %v2217_v20, %v1520_v21  ;;  %v3379_v17 = vld [vmem:[%s3465_s2] sm:$0xf] }
  0x7b   :  { %v1824_v27 = vld [vmem:[%s3464_s1 + $0x278] sm:$0xf0]  ;;  %v2325_v28 = vld [vmem:[%s3464_s1 + $0x36c] sm:$0xf]  ;;  %v1699_v33 = vor.u32 %v2261_v24, %v1696_v25 }
  0x7c   :  { %1133 = vmatpush.bf16.msra.mxu1 %v1875_v61  ;;  %v1952_v29 = vld [vmem:[%s3464_s1 + $0x378] sm:$0xf0]  ;;  %v2357_v30 = vld [vmem:[%s3464_s1 + $0x46c] sm:$0xf]  ;;  %v1827_v34 = vor.u32 %v2293_v26, %v1824_v27 }
  0x7d   :  { %1146 = vmatpush.bf16.msra.mxu2 %v2003_v63  ;;  %1111 = vmatpush.bf16.msrb.mxu3 %v1555_v6  ;;  %v2080_v31 = vld [vmem:[%s3464_s1 + $0x478] sm:$0xf0]  ;;  %v1955_v35 = vor.u32 %v2325_v28, %v1952_v29  ;;  %v2257_v36 = vld [vmem:[%s3464_s1 + $0x14c] sm:$0xf] }
  0x7e   :  { %1121 = vmatpush.bf16.msra.mxu0 %v1731_v7  ;;  %v1680_v37 = vld [vmem:[%s3464_s1 + $0x158] sm:$0xf0]  ;;  %v2289_v38 = vld [vmem:[%s3464_s1 + $0x24c] sm:$0xf]  ;;  %v2083_v39 = vor.u32 %v2357_v30, %v2080_v31  ;;  %v2370_v31 = vld [vmem:[%s3466_s3 + $0x50] sm:$0xff] }
  0x7f   :  { %v1808_v40 = vld [vmem:[%s3464_s1 + $0x258] sm:$0xf0]  ;;  %v2321_v41 = vld [vmem:[%s3464_s1 + $0x34c] sm:$0xf]  ;;  %v1683_v46 = vor.u32 %v2257_v36, %v1680_v37 }
  0x80   :  { %1134 = vmatpush.bf16.msra.mxu1 %v1859_v10  ;;  %v1936_v42 = vld [vmem:[%s3464_s1 + $0x358] sm:$0xf0]  ;;  %v2353_v43 = vld [vmem:[%s3464_s1 + $0x44c] sm:$0xf]  ;;  %v1811_v47 = vor.u32 %v2289_v38, %v1808_v40  ;;  %v2368_v40 = vld [vmem:[%s3466_s3 + $0x40] sm:$0xff] }
  0x81   :  { %1147 = vmatpush.bf16.msra.mxu2 %v1987_v11  ;;  %1112 = vmatpush.bf16.msrb.mxu3 %v1539_v18  ;;  %v2064_v45 = vld [vmem:[%s3464_s1 + $0x458] sm:$0xf0]  ;;  %v1939_v48 = vor.u32 %v2321_v41, %v1936_v42  ;;  %v2253_v49 = vld [vmem:[%s3464_s1 + $0x12c] sm:$0xf] }
  0x82   :  { %1122 = vmatpush.bf16.msra.mxu0 %v1715_v19  ;;  %v1664_v50 = vld [vmem:[%s3464_s1 + $0x138] sm:$0xf0]  ;;  %v2285_v52 = vld [vmem:[%s3464_s1 + $0x22c] sm:$0xf]  ;;  %v2067_v53 = vor.u32 %v2353_v43, %v2064_v45  ;;  %v169_v19 = vperm.slane %v3379_v17, 0 }
  0x83   :  { %v1792_v54 = vld [vmem:[%s3464_s1 + $0x238] sm:$0xf0]  ;;  %v2317_v56 = vld [vmem:[%s3464_s1 + $0x32c] sm:$0xf]  ;;  %v1667_v61 = vor.u32 %v2253_v49, %v1664_v50 }
  0x84   :  { %1135 = vmatpush.bf16.msra.mxu1 %v1843_v22  ;;  %v1920_v58 = vld [vmem:[%s3464_s1 + $0x338] sm:$0xf0]  ;;  %v2349_v59 = vld [vmem:[%s3464_s1 + $0x42c] sm:$0xf]  ;;  %v1795_v63 = vor.u32 %v2285_v52, %v1792_v54  ;;  %v2360_v22 = vld [vmem:[%s3466_s3] sm:$0xff] }
  0x85   :  { %1148 = vmatpush.bf16.msra.mxu2 %v1971_v23  ;;  %1113 = vmatpush.bf16.msrb.mxu3 %v1523_v32  ;;  %v2048_v60 = vld [vmem:[%s3464_s1 + $0x438] sm:$0xf0]  ;;  %v1923_v0 = vor.u32 %v2317_v56, %v1920_v58  ;;  %v2249_v1 = vld [vmem:[%s3464_s1 + $0x10c] sm:$0xf]  ;;  %v2372_v23 = vld [vmem:[%s3466_s3 + $0x60] sm:$0xff] }
  0x86   :  { %1123 = vmatpush.bf16.msra.mxu0 %v1699_v33  ;;  %v2281_v2 = vld [vmem:[%s3464_s1 + $0x20c] sm:$0xf]  ;;  %v2051_v3 = vor.u32 %v2349_v59, %v2048_v60  ;;  %v1776_v4 = vld [vmem:[%s3464_s1 + $0x218] sm:$0xf0]  ;;  %v2380_v52 = vld [vmem:[%s3466_s3 + $0xa0] sm:$0xff] }
  0x87   :  { %v2313_v5 = vld [vmem:[%s3464_s1 + $0x30c] sm:$0xf]  ;;  %v1904_v6 = vld [vmem:[%s3464_s1 + $0x318] sm:$0xf0]  ;;  %v1779_v10 = vor.u32 %v2281_v2, %v1776_v4 }
  0x88   :  { %1136 = vmatpush.bf16.msra.mxu1 %v1827_v34  ;;  %1114 = vmatmul.bf16.vlgmr.msrb.gmra.mxu3 %v2688_v51  ;;  %v1648_v51 = vld [vmem:[%s3464_s1 + $0x118] sm:$0xf0]  ;;  %v2345_v7 = vld [vmem:[%s3464_s1 + $0x40c] sm:$0xf]  ;;  %v1907_v11 = vor.u32 %v2313_v5, %v1904_v6 }
  0x89   :  { %1149 = vmatpush.bf16.msra.mxu2 %v1955_v35  ;;  %1162 = vmatpush.bf16.msra.mxu3 %v2083_v39  ;;  %v2032_v8 = vld [vmem:[%s3464_s1 + $0x418] sm:$0xf0]  ;;  %v1651_v9 = vor.u32 %v2249_v1, %v1648_v51  ;;  %v2365_v15 = vld [vmem:[%s3466_s3 + $0x28] sm:$0xff] }
  0x8a   :  { %1124 = vmatpush.bf16.msra.mxu0 %v1683_v46  ;;  %v2035_v12 = vor.u32 %v2345_v7, %v2032_v8  ;;  %v2367_v13 = vld [vmem:[%s3466_s3 + $0x38] sm:$0xff]  ;;  %v2361_v18 = vld [vmem:[%s3466_s3 + $0x8] sm:$0xff]  ;;  %v2382_v46 = vld [vmem:[%s3466_s3 + $0xb0] sm:$0xff] }
  0x8b   :  { %v2373_v20 = vld [vmem:[%s3466_s3 + $0x68] sm:$0xff]  ;;  %v2371_v27 = vld [vmem:[%s3466_s3 + $0x58] sm:$0xff]  ;;  %v2376_v8 = vld [vmem:[%s3466_s3 + $0x80] sm:$0xff] }
  0x8c   :  { %1137 = vmatpush.bf16.msra.mxu1 %v1811_v47  ;;  %v2369_v37 = vld [vmem:[%s3466_s3 + $0x48] sm:$0xff]  ;;  %v2383_v43 = vld [vmem:[%s3466_s3 + $0xb8] sm:$0xff]  ;;  %v170_v47 = vperm.slane %v3379_v17, 1 }
  0x8d   :  { %1150 = vmatpush.bf16.msra.mxu2 %v1939_v48  ;;  %1163 = vmatpush.bf16.msra.mxu3 %v2067_v53  ;;  %v2381_v50 = vld [vmem:[%s3466_s3 + $0xa8] sm:$0xff]  ;;  %v2379_v60 = vld [vmem:[%s3466_s3 + $0x98] sm:$0xff] }
  0x8e   :  { %1125 = vmatpush.bf16.msra.mxu0 %v1667_v61  ;;  %v2377_v4 = vld [vmem:[%s3466_s3 + $0x88] sm:$0xff] }
  0x90   :  { %1138 = vmatpush.bf16.msra.mxu1 %v1795_v63  ;;  %v2378_v63 = vld [vmem:[%s3466_s3 + $0x90] sm:$0xff] }
  0x91   :  { %1151 = vmatpush.bf16.msra.mxu2 %v1923_v0  ;;  %1164 = vmatpush.bf16.msra.mxu3 %v2051_v3 }
  0x92   :  { %1126 = vmatpush.bf16.msra.mxu0 %v1651_v9  ;;  %v2391_v9 = vld [vmem:[%s3466_s3 + $0xf8] sm:$0xff] }
  0x94   :  { %1139 = vmatpush.bf16.msra.mxu1 %v1779_v10 }
  0x95   :  { %1152 = vmatpush.bf16.msra.mxu2 %v1907_v11  ;;  %1165 = vmatpush.bf16.msra.mxu3 %v2035_v12  ;;  %v2390_v11 = vld [vmem:[%s3466_s3 + $0xf0] sm:$0xff]  ;;  %v2389_v12 = vld [vmem:[%s3466_s3 + $0xe8] sm:$0xff] }
  0x96   :  { %1439 = vmatpush.bf16.msrb.mxu0 %v2367_v13  ;;  %v171_v13 = vperm.slane %v3379_v17, 2 }
  0x97   :  { %1127 = vmatmul.bf16.vlgmr.msra.gmra.mxu0 %v2709_v62  ;;  %1140 = vmatmul.bf16.vlgmr.msra.gmra.mxu1 %v2696_v55  ;;  %v2363_v55 = vld [vmem:[%s3466_s3 + $0x18] sm:$0xff]  ;;  %v2374_v62 = vld [vmem:[%s3466_s3 + $0x70] sm:$0xff] }
  0x98   :  { %1153 = vmatmul.bf16.vlgmr.msra.gmra.mxu2 %v2701_v57  ;;  %2087 = vmatmul.msk.bf16.vlgmr.msra.gmra.mxu3 %vm908_vm0, %v2808_v44  ;;  %v2375_v57 = vld [vmem:[%s3466_s3 + $0x78] sm:$0xff]  ;;  %v2362_v44 = vld [vmem:[%s3466_s3 + $0x10] sm:$0xff] }
  0x99   :  { %1452 = vmatpush.bf16.msrb.mxu1 %v2375_v57  ;;  %1465 = vmatpush.bf16.msrb.mxu2 %v2383_v43  ;;  %v2387_v57 = vld [vmem:[%s3466_s3 + $0xd8] sm:$0xff] }
  0x9a   :  { %1440 = vmatpush.bf16.msrb.mxu0 %v2366_v14  ;;  %1478 = vmatpush.bf16.msrb.mxu3 %v2391_v9 }
  0x9d   :  { %1453 = vmatpush.bf16.msrb.mxu1 %v2374_v62  ;;  %1466 = vmatpush.bf16.msrb.mxu2 %v2382_v46 }
  0x9e   :  { %1441 = vmatpush.bf16.msrb.mxu0 %v2365_v15  ;;  %1479 = vmatpush.bf16.msrb.mxu3 %v2390_v11  ;;  %v2388_v15 = vld [vmem:[%s3466_s3 + $0xe0] sm:$0xff] }
  0xa1   :  { %1454 = vmatpush.bf16.msrb.mxu1 %v2373_v20  ;;  %1467 = vmatpush.bf16.msrb.mxu2 %v2381_v50 }
  0xa2   :  { %1442 = vmatpush.bf16.msrb.mxu0 %v2364_v16  ;;  %1480 = vmatpush.bf16.msrb.mxu3 %v2389_v12 }
  0xa5   :  { %1455 = vmatpush.bf16.msrb.mxu1 %v2372_v23  ;;  %1468 = vmatpush.bf16.msrb.mxu2 %v2380_v52  ;;  %v2385_v23 = vld [vmem:[%s3466_s3 + $0xc8] sm:$0xff] }
  0xa6   :  { %1443 = vmatpush.bf16.msrb.mxu0 %v2363_v55  ;;  %v920_v21 = vpop.f32.mrf.mxu0  ;;  %1481 = vmatpush.bf16.msrb.mxu3 %v2388_v15 }
  0xa7   :  { %v921_v24 = vadd.f32 %v920_v21, %v169_v19  ;;  %v2386_v19 = vld [vmem:[%s3466_s3 + $0xd0] sm:$0xff] }
  0xa8   :  { %v933_v25 = vpop.f32.mrf.mxu1 }
  0xa9   :  { %v934_v26 = vadd.f32 %v933_v25, %v921_v24  ;;  %1456 = vmatpush.bf16.msrb.mxu1 %v2371_v27  ;;  %1469 = vmatpush.bf16.msrb.mxu2 %v2379_v60  ;;  %v2384_v27 = vld [vmem:[%s3466_s3 + $0xc0] sm:$0xff] }
  0xaa   :  { %1444 = vmatpush.bf16.msrb.mxu0 %v2362_v44  ;;  %1482 = vmatpush.bf16.msrb.mxu3 %v2387_v57 }
  0xac   :  { %v946_v28 = vpop.f32.mrf.mxu2 }
  0xad   :  { %v959_v29 = vpop.f32.mrf.mxu3  ;;  %v947_v32 = vadd.f32 %v946_v28, %v934_v26  ;;  %1457 = vmatpush.bf16.msrb.mxu1 %v2370_v31  ;;  %1470 = vmatpush.bf16.msrb.mxu2 %v2378_v63 }
  0xae   :  { %1445 = vmatpush.bf16.msrb.mxu0 %v2361_v18  ;;  %v922_v30 = vpop.f32.mrf.mxu0  ;;  %1483 = vmatpush.bf16.msrb.mxu3 %v2386_v19 }
  0xaf   :  { %v960_v34 = vadd.f32 %v959_v29, %v947_v32 }
  0xb0   :  { %v935_v33 = vpop.f32.mrf.mxu1 }
  0xb1   :  { %1458 = vmatpush.bf16.msrb.mxu1 %v2369_v37  ;;  %1471 = vmatpush.bf16.msrb.mxu2 %v2377_v4 }
  0xb2   :  { %1446 = vmatpush.bf16.msrb.mxu0 %v2360_v22  ;;  %1484 = vmatpush.bf16.msrb.mxu3 %v2385_v23 }
  0xb4   :  { %v948_v35 = vpop.f32.mrf.mxu2 }
  0xb5   :  { %v961_v36 = vpop.f32.mrf.mxu3  ;;  %1459 = vmatpush.bf16.msrb.mxu1 %v2368_v40  ;;  %1472 = vmatpush.bf16.msrb.mxu2 %v2376_v8 }
  0xb6   :  { %v972_v38 = vpop.f32.mrf.mxu0  ;;  %1485 = vmatpush.bf16.msrb.mxu3 %v2384_v27 }
  0xb7   :  { %v973_v39 = vadd.f32 %v972_v38, %v960_v34  ;;  %v172_v34 = vperm.slane %v3379_v17, 3  ;;  %v2393_v17 = vld [vmem:[%s3467_s4] ss:$0 sm:$0xff] }
  0xb9   :  { %v1171_v41 = vmax.f32 %v973_v39, 0.0 }
  0xbb   :  { %v1175_v42 = vpack.c.bf16 %v1171_v41, %v1171_v41 }
  0xbd   :  { %1447 = vmatmul.bf16.vlgmr.msrb.gmra.mxu0 %v1175_v42 }
  0xbe   :  { %v974_v45 = vpop.f32.mrf.mxu0 }
  0xc4   :  { %v985_v48 = vpop.f32.mrf.mxu1 }
  0xc5   :  { %v986_v49 = vadd.f32 %v985_v48, %v170_v47 }
  0xc9   :  { %v998_v53 = vpop.f32.mrf.mxu2 }
  0xca   :  { %v999_v58 = vadd.f32 %v998_v53, %v986_v49 }
  0xcc   :  { %v1011_v54 = vpop.f32.mrf.mxu3  ;;  %v987_v56 = vpop.f32.mrf.mxu1 }
  0xcd   :  { %v1012_v59 = vadd.f32 %v1011_v54, %v999_v58 }
  0xd1   :  { %v1000_v1 = vpop.f32.mrf.mxu2 }
  0xd2   :  { %v1024_v61 = vpop.f32.mrf.mxu0 }
  0xd3   :  { %v1025_v0 = vadd.f32 %v1024_v61, %v1012_v59 }
  0xd4   :  { %v1013_v51 = vpop.f32.mrf.mxu3  ;;  %v1037_v2 = vpop.f32.mrf.mxu1 }
  0xd5   :  { %v1038_v3 = vadd.f32 %v1037_v2, %v1025_v0 }
  0xd7   :  { %v1172_v5 = vmax.f32 %v1038_v3, 0.0 }
  0xd9   :  { %v1176_v7 = vpack.c.bf16 %v1172_v5, %v1172_v5 }
  0xda   :  { %v1026_v6 = vpop.f32.mrf.mxu0 }
  0xdb   :  { %1460 = vmatmul.bf16.vlgmr.msrb.gmra.mxu1 %v1176_v7 }
  0xdc   :  { %v1039_v10 = vpop.f32.mrf.mxu1 }
  0xeb   :  { %v1050_v14 = vpop.f32.mrf.mxu2 }
  0xec   :  { %v1051_v55 = vadd.f32 %v1050_v14, %v171_v13 }
  0xed   :  { %v1063_v16 = vpop.f32.mrf.mxu3 }
  0xee   :  { %v1064_v62 = vadd.f32 %v1063_v16, %v1051_v55 }
  0xf3   :  { %v1052_v44 = vpop.f32.mrf.mxu2 }
  0xf4   :  { %v1076_v18 = vpop.f32.mrf.mxu0  ;;  %v1089_v21 = vpop.f32.mrf.mxu1 }
  0xf5   :  { %v1065_v20 = vpop.f32.mrf.mxu3  ;;  %v1077_v22 = vadd.f32 %v1076_v18, %v1064_v62 }
  0xf7   :  { %v1090_v24 = vadd.f32 %v1089_v21, %v1077_v22 }
  0xfb   :  { %v1102_v28 = vpop.f32.mrf.mxu2 }
  0xfc   :  { %v1078_v25 = vpop.f32.mrf.mxu0  ;;  %v1091_v26 = vpop.f32.mrf.mxu1  ;;  %v1103_v29 = vadd.f32 %v1102_v28, %v1090_v24 }
  0xfe   :  { %v1173_v30 = vmax.f32 %v1103_v29, 0.0 }
 0x100   :  { %v1177_v31 = vpack.c.bf16 %v1173_v30, %v1173_v30 }
 0x102   :  { %1473 = vmatmul.bf16.vlgmr.msrb.gmra.mxu2 %v1177_v31 }
 0x103   :  { %v1104_v32 = vpop.f32.mrf.mxu2 }
 0x10b   :  { %v1115_v33 = vpop.f32.mrf.mxu3 }
 0x10c   :  { %v1116_v35 = vadd.f32 %v1115_v33, %v172_v34 }
 0x113   :  { %v1117_v39 = vpop.f32.mrf.mxu3 }
 0x114   :  { %v1128_v36 = vpop.f32.mrf.mxu0  ;;  %v1141_v37 = vpop.f32.mrf.mxu1 }
 0x115   :  { %v1129_v38 = vadd.f32 %v1128_v36, %v1116_v35 }
 0x117   :  { %v1142_v40 = vadd.f32 %v1141_v37, %v1129_v38 }
 0x11b   :  { %v1154_v41 = vpop.f32.mrf.mxu2  ;;  %v1167_v46 = vpop.f32.mrf.mxu3 }
 0x11c   :  { %v1155_v42 = vadd.f32 %v1154_v41, %v1142_v40  ;;  %v1130_v43 = vpop.f32.mrf.mxu0  ;;  %v1143_v45 = vpop.f32.mrf.mxu1 }
 0x11e   :  { %v1168_v47 = vadd.f32 %v1167_v46, %v1155_v42 }
 0x120   :  { %v1174_v48 = vmax.f32 %v1168_v47, 0.0 }
 0x122   :  { %v1178_v49 = vpack.c.bf16 %v1174_v48, %v1174_v48 }
 0x123   :  { %v1156_v50 = vpop.f32.mrf.mxu2  ;;  %v1169_v52 = vpop.f32.mrf.mxu3 }
 0x124   :  { %1486 = vmatmul.bf16.vlgmr.msrb.gmra.mxu3 %v1178_v49 }
 0x13a   :  { %v1448_v53 = vpop.f32.mrf.mxu0 }
 0x13b   :  { %v1449_v56 = vadd.f32 %v2393_v17, %v1448_v53 }
 0x142   :  { %v1450_v54 = vpop.f32.mrf.mxu0 }
 0x158   :  { %v1461_v58 = vpop.f32.mrf.mxu1 }
 0x159   :  { %v1462_v59 = vadd.f32 %v1461_v58, %v1449_v56 }
 0x160   :  { %v1463_v60 = vpop.f32.mrf.mxu1 }
 0x185   :  { %v1474_v61 = vpop.f32.mrf.mxu2 }
 0x186   :  { %v1475_v0 = vadd.f32 %v1474_v61, %v1462_v59 }
 0x18d   :  { %v1476_v63 = vpop.f32.mrf.mxu2 }
 0x1a7   :  { %v1487_v1 = vpop.f32.mrf.mxu3 }
 0x1a8   :  { %v1488_v51 = vadd.f32 %v1487_v1, %v1475_v0 }
 0x1aa   :  { %1491 = vst [vmem:[#allocation2] sm:$0x3] %v1488_v51 }
 0x1ab   :  { %1502 = dma.vmem_to_hbm [thread:$0]  %s1498_s14, 32, %s1500_s17, [#allocation3]  }
 0x1af   :  { %v1489_v2 = vpop.f32.mrf.mxu3 }
 0x1b0   :  { %2418 = dma.done.wait [#allocation3], 32  }
 0x1b1   :  { %2419 = vsyncadd [#allocation3], 4294967264 }
 0x1b2   :  { %1507 = vsyncpa [#allocation3], 1 }

</bundles_post_ra>
